<compile_context>
chip_gen: v7x
topology: tpu7x:2x2x1
jax: 0.10.0
libtpu: 0.0.40
codegen_flags: <defaults>
</compile_context>

<pallas_src>
import functools

import jax
import jax.numpy as jnp
import numpy as np
from jax.experimental import pallas as pl
from jax.experimental.pallas import tpu as pltpu

_SAMPLES_PER_ROW = 128
_ROW_W = 27 * _SAMPLES_PER_ROW          # 3456 lanes per row (27 vregs)
_NCORES = 2                             # core-parallel split (no-op on 1-TC chips)


def _cdiv(a, b):
    return -(-a // b)


def _round_up(a, m):
    return _cdiv(a, m) * m


def _gamma_kernel(x_ref, w_ref, o_ref, acc_ref, *, rows, tile_rows, g_steps,
                  ragged, acc_rows, groups):
    """One (core, step) tile of the gamma-variance numerator.

    x_ref  : VMEM [tile_rows, 3456] f32 -- 128 samples x 27 coeffs per row
    w_ref  : VMEM [1, 3456]         f32 -- 1/3 on middle-channel lanes, else 0
    o_ref  : VMEM [1, 8, 128]       f32 -- per-core partial sum (broadcast)
    acc_ref: VMEM [acc_rows, 3456]  f32 -- running vector accumulator
    """
    p = pl.program_id(0)
    g = pl.program_id(1)

    @pl.when(g == 0)
    def _init():
        acc_ref[...] = jnp.zeros_like(acc_ref)

    x = x_ref[...]
    w = w_ref[...]
    # Channel sum (g0+g1+g2) lands on the middle-channel lanes.  Shifts of +9
    # and +(ROW_W-9) make this independent of the rotate direction convention.
    z = x + pltpu.roll(x, shift=9, axis=1) + pltpu.roll(x, shift=_ROW_W - 9, axis=1)
    contrib = x * x - (z * z) * w        # per-element numerator contribution

    def _accumulate(c):
        part = c[0:acc_rows, :]
        for i in range(1, groups):
            part = part + c[i * acc_rows:(i + 1) * acc_rows, :]
        acc_ref[...] += part

    if ragged:
        n_valid = rows - (p * g_steps + g) * tile_rows

        @pl.when(n_valid >= tile_rows)       # fast path: full block, no mask
        def _full():
            _accumulate(contrib)

        @pl.when(n_valid < tile_rows)        # partial or fully out-of-range block
        def _partial():
            row_id = jax.lax.broadcasted_iota(jnp.int32, (tile_rows, 1), 0)
            # select (not multiply): garbage rows cannot leak NaN/Inf.
            _accumulate(jnp.where(row_id < n_valid, contrib, 0.0))
    else:
        _accumulate(contrib)

    @pl.when(g == pl.num_programs(1) - 1)
    def _finalize():
        o_ref[...] = jnp.full(o_ref.shape, jnp.sum(acc_ref[...]), jnp.float32)


def _main_numerator(x2d, block_rows):
    """Pallas sum of sum_c (g_c - mean_c)^2 over the lane-dense main part."""
    rows = x2d.shape[0]

    block_rows = max(8, (block_rows // 8) * 8)           # enforce 8-divisible tiles
    tr = min(block_rows, _round_up(_cdiv(rows, _NCORES), 8))
    if tr >= rows:
        tr = rows                                        # full-dim block is legal
    nb = _cdiv(rows, tr)                                 # real row-blocks
    g_steps = _cdiv(nb, _NCORES)                         # inner ("arbitrary") extent
    ragged = (_NCORES * g_steps * tr != rows)
    acc_rows = 8 if (tr % 8 == 0) else tr
    groups = tr // acc_rows

    lane = np.arange(_ROW_W) % 27
    w_row = np.where((lane >= 9) & (lane < 18), 1.0 / 3.0, 0.0).astype(np.float32)
    w_row = jnp.asarray(w_row.reshape(1, _ROW_W))

    kernel = functools.partial(
        _gamma_kernel, rows=rows, tile_rows=tr, g_steps=g_steps,
        ragged=ragged, acc_rows=acc_rows, groups=groups)

    out = pl.pallas_call(
        kernel,
        grid=(_NCORES, g_steps),
        in_specs=[
            pl.BlockSpec((tr, _ROW_W),
                         lambda p, g: (jnp.minimum(p * g_steps + g, nb - 1), 0)),
            pl.BlockSpec((1, _ROW_W), lambda p, g: (0, 0)),
        ],
        out_specs=pl.BlockSpec((1, 8, 128), lambda p, g: (p, 0, 0)),
        out_shape=jax.ShapeDtypeStruct((_NCORES, 8, 128), jnp.float32),
        scratch_shapes=[pltpu.VMEM((acc_rows, _ROW_W), jnp.float32)],
        compiler_params=pltpu.CompilerParams(
            dimension_semantics=("parallel", "arbitrary"),
            vmem_limit_bytes=32 * 1024 * 1024,
        ),
        cost_estimate=pl.CostEstimate(
            flops=8 * rows * _ROW_W,
            transcendentals=0,
            bytes_accessed=rows * _ROW_W * 4 + _ROW_W * 4 + _NCORES * 8 * 128 * 4),
    )(x2d, w_row)
    return jnp.sum(out[:, 0, 0])


def gamma_loss_from_array(gamma, *, block_rows=256):
    """Pallas equivalent of GammaLoss.forward on the raw gamma tensor."""
    g2d = jnp.asarray(gamma, jnp.float32).reshape(-1, 27)
    batch = g2d.shape[0]
    b_main = (batch // _SAMPLES_PER_ROW) * _SAMPLES_PER_ROW

    total = jnp.float32(0.0)
    if b_main > 0:
        x2d = g2d[:b_main].reshape(b_main // _SAMPLES_PER_ROW, _ROW_W)  # free reshape
        total = total + _main_numerator(x2d, block_rows)
    if b_main < batch:
        # <=127-sample ragged tail (or an entire tiny batch): plain JAX beats
        # pallas_call launch overhead at this size (perf-review item).
        tail = g2d[b_main:].reshape(-1, 3, 9)
        tail_mean = jnp.mean(tail, axis=1, keepdims=True)
        total = total + jnp.sum((tail - tail_mean) ** 2)
    return total / jnp.float32(batch * 27)


def gamma_loss(coeffs_dict):
    """Mirror of GammaLoss.forward(coeffs_dict)."""
    return gamma_loss_from_array(coeffs_dict["gamma"])


def _reference_gamma_loss(gamma):
    """Pure-JAX reference mirroring the PyTorch forward (for verification)."""
    g = jnp.asarray(gamma, jnp.float32).reshape(-1, 3, 9)
    m = jnp.mean(g, axis=1, keepdims=True)
    return jnp.mean((g - m) ** 2)


if __name__ == "__main__":
    key = jax.random.PRNGKey(0)
    k1, k2, k3, k4 = jax.random.split(key, 4)

    # Case 1: small tiles -> multi-step grid per core, ragged last block and
    # clamped overhang step on the second "core" of the parallel axis.
    gamma1 = jax.random.normal(k1, (5120, 3, 9), dtype=jnp.float32)
    out1 = jax.block_until_ready(gamma_loss_from_array(gamma1, block_rows=8))
    ref1 = _reference_gamma_loss(gamma1)
    assert jnp.allclose(out1, ref1, rtol=1e-4, atol=1e-6), (out1, ref1)

    # Case 2: default tiling under jit, batch divides evenly -> unmasked path,
    # balanced split across the core-parallel axis.
    gamma2 = jax.random.normal(k2, (6144, 3, 9), dtype=jnp.float32)
    out2 = jax.block_until_ready(jax.jit(gamma_loss)({"gamma": gamma2}))
    ref2 = _reference_gamma_loss(gamma2)
    assert jnp.allclose(out2, ref2, rtol=1e-4, atol=1e-6), (out2, ref2)

    # Case 3: batch not a multiple of 128 -> kernel on the 128-sample main
    # part + pure-JAX 72-sample tail.
    gamma3 = jax.random.normal(k3, (200, 27), dtype=jnp.float32)
    out3 = jax.block_until_ready(gamma_loss({"gamma": gamma3}))
    ref3 = _reference_gamma_loss(gamma3)
    assert jnp.allclose(out3, ref3, rtol=1e-4, atol=1e-6), (out3, ref3)

    # Case 4: tiny batch -> pure-JAX path (kernel overhead not worth it).
    gamma4 = jax.random.normal(k4, (6, 27), dtype=jnp.float32)
    out4 = jax.block_until_ready(gamma_loss({"gamma": gamma4}))
    ref4 = _reference_gamma_loss(gamma4)
    assert jnp.allclose(out4, ref4, rtol=1e-4, atol=1e-6), (out4, ref4)

    print("KERNEL_OK")
</pallas_src>

<mosaic_0001>
module attributes {stable_mosaic.version = 11 : i64} {
  func.func @_gamma_kernel(%arg0: i32, %arg1: i32, %arg2: memref<8x3456xf32, #tpu.memory_space<vmem>>, %arg3: memref<1x3456xf32, #tpu.memory_space<vmem>>, %arg4: memref<1x8x128xf32, #tpu.memory_space<vmem>>, %arg5: memref<8x3456xf32, #tpu.memory_space<vmem>>) attributes {dimension_semantics = [#tpu.dimension_semantics<parallel>, #tpu.dimension_semantics<arbitrary>], iteration_bounds = array<i64: 2, 3>, scalar_prefetch = 0 : i64, scratch_operands = 1 : i64, tpu.core_type = #tpu.core_type<tc>, window_params = [{transform_indices = @transform_0, window_bounds = array<i64: 8, 3456>}, {pipeline_mode = #tpu.pipeline_mode<synchronous>, transform_indices = @transform_1, window_bounds = array<i64: 1, 3456>}, {transform_indices = @transform_2, window_bounds = array<i64: 1, 8, 128>}]} {
    %c0_i32 = arith.constant 0 : i32
    %0 = arith.cmpi eq, %arg1, %c0_i32 : i32
    %1 = arith.extui %0 : i1 to i32
    %c0_i32_0 = arith.constant 0 : i32
    %2 = arith.cmpi ne, %1, %c0_i32_0 : i32
    scf.if %2 {
      %cst = arith.constant 0.000000e+00 : f32
      %27 = vector.broadcast %cst : f32 to vector<8x3456xf32>
      %c0_9 = arith.constant 0 : index
      %c0_10 = arith.constant 0 : index
      %28 = vector.load %arg5[%c0_9, %c0_10] : memref<8x3456xf32, #tpu.memory_space<vmem>>, vector<8x3456xf32>
      tpu.vector_store %arg5[%c0_9, %c0_10], %27 {strides = array<i32>} : memref<8x3456xf32, #tpu.memory_space<vmem>>, vector<8x3456xf32>,
    } else {
    }
    %c0 = arith.constant 0 : index
    %c0_1 = arith.constant 0 : index
    %3 = vector.load %arg2[%c0, %c0_1] : memref<8x3456xf32, #tpu.memory_space<vmem>>, vector<8x3456xf32>
    %c0_2 = arith.constant 0 : index
    %c0_3 = arith.constant 0 : index
    %4 = vector.load %arg3[%c0_2, %c0_3] : memref<1x3456xf32, #tpu.memory_space<vmem>>, vector<1x3456xf32>
    %c9_i32 = arith.constant 9 : i32
    %5 = tpu.dynamic_rotate %3 by %c9_i32 dim 1 : vector<8x3456xf32>, i32 -> vector<8x3456xf32>
    %6 = arith.addf %3, %5 : vector<8x3456xf32>
    %c3447_i32 = arith.constant 3447 : i32
    %7 = tpu.dynamic_rotate %3 by %c3447_i32 dim 1 : vector<8x3456xf32>, i32 -> vector<8x3456xf32>
    %8 = arith.addf %6, %7 : vector<8x3456xf32>
    %9 = arith.mulf %3, %3 : vector<8x3456xf32>
    %10 = arith.mulf %8, %8 : vector<8x3456xf32>
    %11 = vector.broadcast %4 : vector<1x3456xf32> to vector<8x3456xf32>
    %12 = arith.mulf %10, %11 : vector<8x3456xf32>
    %13 = arith.subf %9, %12 : vector<8x3456xf32>
    %c3_i32 = arith.constant 3 : i32
    %14 = arith.muli %arg0, %c3_i32 : i32
    %15 = arith.addi %14, %arg1 : i32
    %c8_i32 = arith.constant 8 : i32
    %16 = arith.muli %15, %c8_i32 : i32
    %c40_i32 = arith.constant 40 : i32
    %17 = arith.subi %c40_i32, %16 : i32
    %c8_i32_4 = arith.constant 8 : i32
    %18 = arith.cmpi sge, %17, %c8_i32_4 : i32
    %19 = arith.extui %18 : i1 to i32
    %c0_i32_5 = arith.constant 0 : i32
    %20 = arith.cmpi ne, %19, %c0_i32_5 : i32
    scf.if %20 {
      %c0_9 = arith.constant 0 : index
      %c0_10 = arith.constant 0 : index
      %27 = vector.load %arg5[%c0_9, %c0_10] : memref<8x3456xf32, #tpu.memory_space<vmem>>, vector<8x3456xf32>
      %28 = arith.addf %27, %13 : vector<8x3456xf32>
      %c0_11 = arith.constant 0 : index
      %c0_12 = arith.constant 0 : index
      %29 = vector.load %arg5[%c0_11, %c0_12] : memref<8x3456xf32, #tpu.memory_space<vmem>>, vector<8x3456xf32>
      tpu.vector_store %arg5[%c0_11, %c0_12], %28 {strides = array<i32>} : memref<8x3456xf32, #tpu.memory_space<vmem>>, vector<8x3456xf32>,
    } else {
    }
    %c8_i32_6 = arith.constant 8 : i32
    %21 = arith.cmpi slt, %17, %c8_i32_6 : i32
    %22 = arith.extui %21 : i1 to i32
    %c0_i32_7 = arith.constant 0 : i32
    %23 = arith.cmpi ne, %22, %c0_i32_7 : i32
    scf.if %23 {
      %27 = tpu.iota {dimensions = array<i32: 0>} : vector<8x1xi32>
      %28 = vector.broadcast %17 : i32 to vector<8x1xi32>
      %29 = arith.cmpi slt, %27, %28 : vector<8x1xi32>
      %cst = arith.constant 0.000000e+00 : f32
      %30 = vector.shape_cast %29 : vector<8x1xi1> to vector<8x1xi1>
      %31 = vector.broadcast %30 : vector<8x1xi1> to vector<8x3456xi1>
      %32 = vector.broadcast %cst : f32 to vector<8x3456xf32>
      %33 = arith.select %31, %13, %32 : vector<8x3456xi1>, vector<8x3456xf32>
      %c0_9 = arith.constant 0 : index
      %c0_10 = arith.constant 0 : index
      %34 = vector.load %arg5[%c0_9, %c0_10] : memref<8x3456xf32, #tpu.memory_space<vmem>>, vector<8x3456xf32>
      %35 = arith.addf %34, %33 : vector<8x3456xf32>
      %c0_11 = arith.constant 0 : index
      %c0_12 = arith.constant 0 : index
      %36 = vector.load %arg5[%c0_11, %c0_12] : memref<8x3456xf32, #tpu.memory_space<vmem>>, vector<8x3456xf32>
      tpu.vector_store %arg5[%c0_11, %c0_12], %35 {strides = array<i32>} : memref<8x3456xf32, #tpu.memory_space<vmem>>, vector<8x3456xf32>,
    } else {
    }
    %c2_i32 = arith.constant 2 : i32
    %24 = arith.cmpi eq, %arg1, %c2_i32 : i32
    %25 = arith.extui %24 : i1 to i32
    %c0_i32_8 = arith.constant 0 : i32
    %26 = arith.cmpi ne, %25, %c0_i32_8 : i32
    scf.if %26 {
      %c0_9 = arith.constant 0 : index
      %c0_10 = arith.constant 0 : index
      %27 = vector.load %arg5[%c0_9, %c0_10] : memref<8x3456xf32, #tpu.memory_space<vmem>>, vector<8x3456xf32>
      %28 = vector.shape_cast %27 : vector<8x3456xf32> to vector<1x8x3456xf32>
      %cst = arith.constant dense<0.000000e+00> : vector<1xf32>
      %29 = vector.multi_reduction <add>, %28, %cst [1, 2] : vector<1x8x3456xf32> to vector<1xf32>
      %30 = vector.shape_cast %29 : vector<1xf32> to vector<1x1x1xf32>
      %31 = vector.extract %30[0, 0, 0] : f32 from vector<1x1x1xf32>
      %32 = vector.broadcast %31 : f32 to vector<1x8x128xf32>
      %c0_11 = arith.constant 0 : index
      %c0_12 = arith.constant 0 : index
      %c0_13 = arith.constant 0 : index
      %33 = vector.load %arg4[%c0_11, %c0_12, %c0_13] : memref<1x8x128xf32, #tpu.memory_space<vmem>>, vector<1x8x128xf32>
      tpu.vector_store %arg4[%c0_11, %c0_12, %c0_13], %32 {strides = array<i32>} : memref<1x8x128xf32, #tpu.memory_space<vmem>>, vector<1x8x128xf32>,
    } else {
    }
    return
  }
  func.func @transform_0(%arg0: i32, %arg1: i32) -> (i32, i32) {
    %c3_i32 = arith.constant 3 : i32
    %0 = arith.muli %arg0, %c3_i32 : i32
    %1 = arith.addi %0, %arg1 : i32
    %c4_i32 = arith.constant 4 : i32
    %2 = arith.minsi %1, %c4_i32 : i32
    %c0_i32 = arith.constant 0 : i32
    %c0_i32_0 = arith.constant 0 : i32
    return %2, %c0_i32 : i32, i32
  }
  func.func @transform_1(%arg0: i32, %arg1: i32) -> (i32, i32) {
    %c0_i32 = arith.constant 0 : i32
    %c0_i32_0 = arith.constant 0 : i32
    %c0_i32_1 = arith.constant 0 : i32
    return %c0_i32, %c0_i32_0 : i32, i32
  }
  func.func @transform_2(%arg0: i32, %arg1: i32) -> (i32, i32, i32) {
    %c0_i32 = arith.constant 0 : i32
    %c0_i32_0 = arith.constant 0 : i32
    %c0_i32_1 = arith.constant 0 : i32
    return %arg0, %c0_i32, %c0_i32_0 : i32, i32, i32
  }
}

</mosaic_0001>

<bundles_post_ra>
// kernel: tpu_custom_call.1
= control target key start
LH: loop header
LB: loop body
LE: loop exit
PB: predicated region body
PF: predicated region fallthrough
CT: control target
= control target key end

     0   :  { %s2512_s0 = inlined_call_operand.hbm [shape: f32[40,3456], index: 0, kind: input, shape index: {}]   ;;  %s2513_s1 = inlined_call_operand.hbm [shape: f32[1,3456], index: 1, kind: input, shape index: {}]   ;;  %s2514_s2 = inlined_call_operand.hbm [shape: f32[2,8,128], index: 2, kind: output, shape index: {}]  }
   0x1   :  { %2547 = sst [smem:[#allocation47_spill]] %s2513_s1 }
   0x2   :  { %7 = vsyncpa [#allocation4], 0 }
   0x3   :  { %9 = vsyncpa [#allocation4 + $0x1], 0 }
   0x4   :  { %10 = vsyncpa [#allocation7], 0 }
   0x5   :  { %11 = vsyncpa [#allocation5], 0 }
   0x6   :  { %13 = vsyncpa [#allocation5 + $0x1], 0  ;;  %s1456_s9 = smov 0   ;;  %s1458_s10 = smov 0  }
   0x7   :  { %s1460_s11 = smov 0   ;;  %s1462_s12 = smov 0  }
   0x8   :  { %s1464_s13 = smov 0   ;;  %s1466_s14 = smov 0  }
   0x9   :  { %s1468_s15 = smov 0   ;;  %s1470_s16 = smov 0  }
   0xa   :  { %s1472_s17 = smov 0   ;;  %s1474_s18 = smov 0  }
   0xb   :  { %s1476_s19 = smov 0  }
   0xc LB: > { %2548 = sst [smem:[#allocation12_spill]] %s1425_s17  ;;  %s1110_s20 = sadd.s32 4294967295, %s1433_s19   ;;  %s1433_s19 = sphi %s1476_s19, %s19_s19   ;;  %s1429_s18 = sphi %s1474_s18, %s2635_s18   ;;  %s1425_s17 = sphi %s1472_s17, %s2634_s17   ;;  %s1421_s16 = sphi %s1470_s16, %s2633_s16   ;;  %s1417_s15 = sphi %s1468_s15, %s2632_s15   ;;  %s1413_s14 = sphi %s1466_s14, %s2641_s14   ;;  %s1409_s13 = sphi %s1464_s13, %s2640_s13   ;;  %s1405_s12 = sphi %s1462_s12, %s2639_s12   ;;  %s1401_s11 = sphi %s1460_s11, %s2638_s11   ;;  %s1397_s10 = sphi %s1458_s10, %s2637_s10   ;;  %s1393_s9 = sphi %s1456_s9, %s2636_s9  }
   0xd   : > { %2549 = sst [smem:[#allocation13_spill]] %s1429_s18  ;;  %s1111_s21 = sadd.s32 4294967294, %s1433_s19  }
   0xe   : > { %p59_p0 = scmp.ne.s32.totalorder %s1409_s13, %s1405_s12  ;;  %p1512_p1 = scmp.eq.s32.totalorder %s1110_s20, 0 }
   0xf   : > { %s93_s23 = sadd.s32 1, %s1401_s11  ;;  %p103_p2 = scmp.ne.s32.totalorder %s1401_s11, %s1397_s10 }
  0x10   : > { %s2550_s22 = scalar_select %p1512_p1, 1, 0 }
  0x11   : > { %p1521_p3 = por %p1512_p1, %p59_p0  ;;  %p104_p4 = scmp.eq.s32.totalorder %s1110_s20, 5 }
  0x12   : > { %p109_p5 = scmp.ne.s32.totalorder %s1397_s10, %s1393_s9  ;;  %p110_p6 = scmp.eq.s32.totalorder %s1111_s21, 5 }
  0x13   : > { %s2551_s24 = scalar_select %p1521_p3, 1, 0 }
  0x14   : > { %p1527_p7 = por %p104_p4, %p103_p2  ;;  %p1112_p8 = scmp.ge.s32.totalorder %s1433_s19, 1 }
  0x15   : > { %p1532_p9 = por %p110_p6, %p109_p5  ;;  %p117_p10 = scmp.lt.s32.totalorder %s1433_s19, 7 }
  0x16   : > { %s2552_s25 = scalar_select %p1527_p7, 1, 0 }
  0x17   : > { %s2553_s26 = scalar_select %p1532_p9, 1, 0 }
  0x18   : > { %p1537_p11 = pnand %p1112_p8, %p117_p10  ;;  %s1435_s28 = smov [#allocation6]  }
  0x19   : > { %s130_s29 = sshll.u32 %s1435_s28, 4  ;;  %s28_s3 = sadd.s32 1, %s1425_s17  ;;  %s131_s29 = int_to_ptr.vmem [resolvable:$true] %s130_s29 }
  0x1a   : > { %s2554_s27 = scalar_select %p1537_p11, 1, 0 }
  0x1b   : > { %p1141_p12 = pneg %p1537_p11  ;;  %s2556_s1 = sld [smem:[#allocation47_spill]] }
  0x1d   : > { %p1545_p13 = pnand %p1141_p12, %p1512_p1 }
  0x1f   : > { %p1251_p2 = pneg %p1545_p13 }
  0x21   : > { %s1249_s6 = scalar_lea.hbm %s2556_s1, 432 }
  0x22   : > { %p1250_p0 = scmp.ne.s32.totalorder %s2556_s1, %s1249_s6  ;;  %p1256_p6 = scmp.lt.u32.totalorder %s1249_s6, %s2556_s1 }
  0x24   : > { %p1252_p4 = pnand %p1251_p2, %p1250_p0 }
  0x26   : > { %p1253_p5 = pneg %p1252_p4 }
  0x28   : > { %p1258_p8 = pnand %p1256_p6, %p1253_p5 }
  0x2a   : > { %1261 = shalt.err (!%p1258_p8)
}
  0x2b   : > { %s1262_s21 = scalar_lea.vmem %s131_s29, 432  ;;  %s1269_s28 = scalar_lea.vmem %s131_s29, 448 }
  0x2c   : > { %p1263_p10 = scmp.ne.s32.totalorder %s131_s29, %s1262_s21  ;;  %p1270_p7 = scmp.lt.s32.totalorder %s131_s29, %s131_s29 }
  0x2d   : > { %p1271_p1 = scmp.lt.s32.totalorder %s1269_s28, %s1262_s21 }
  0x2e   : > { %p1265_p12 = pnand %p1263_p10, %p1251_p2 }
  0x2f   : > { %p1272_p3 = por %p1271_p1, %p1270_p7 }
  0x30   : > { %p1266_p9 = pneg %p1265_p12 }
  0x32   : > { %p1273_p11 = pnand %p1272_p3, %p1266_p9 }
  0x34   : > { %1276 = shalt.err (!%p1273_p11)
}
  0x35   : > { %1144 = dma.hbm_to_vmem [thread:$0]  (!%p1545_p13), %s2556_s1, 432, %s131_s29, [#allocation7]  }
  0x36   : > { %p29_p0 = scmp.ge.s32.totalorder %s28_s3, 3  ;;  %s31_s6 = sadd.s32 1, %s1429_s18 }
  0x37   : > { %s35_s7 = smul.u32 3, %s1429_s18  ;;  %s46_s8 = sadd.s32 1, %s1413_s14 }
  0x38   : > { %s2643_s3 = smov (%p29_p0, %s28_s3), 0  ;;  %s2645_s6 = smov (!%p29_p0, %s31_s6), %s1429_s18 }
  0x39   : > { %2557 = sst [smem:[#allocation14_spill]] %s2643_s3  ;;  %s36_s30 = sadd.s32 %s1425_s17, %s35_s7 }
  0x3a   : > { %p53_p1 = scmp.ne.s32.totalorder %s1413_s14, %s1409_s13  ;;  %p33_p3 = scmp.ge.s32.totalorder %s2645_s6, 2 }
  0x3b   : > { %p37_p7 = scmp.lt.s32.totalorder %s36_s30, 4  ;;  %p54_p9 = scmp.eq.s32.totalorder %s1433_s19, 0 }
  0x3c   : > { %p1154_p11 = scmp.lt.s32.totalorder %s1433_s19, 6  ;;  %s2647_s6 = smov (%p33_p3, %s2645_s6), 0 }
  0x3d   : > { %2558 = sst [smem:[#allocation15_spill]] %s2647_s6  ;;  %s2649_s30 = smov (!%p37_p7, %s36_s30), 4 }
  0x3e   : > { %s39_s29 = smul.u32 3, %s2647_s6  ;;  %p55_p13 = por %p54_p9, %p53_p1 }
  0x3f   : > { %s90_s12 = ssub.s32 %s1429_s18, %s2647_s6  ;;  %s141_s20 = sand.u32 1, %s1413_s14  }
  0x40   : > { %s40_s21 = sadd.s32 %s39_s29, %s2643_s3  ;;  %p91_p2 = scmp.eq.s32.totalorder %s90_s12, 0 }
  0x41   : > { %p41_p4 = scmp.lt.s32.totalorder %s40_s21, 4  ;;  %s1128_s4 = smul.u32 216, %s141_s20 }
  0x42   : > { %s1587_s28 = scalar_select %p91_p2, %s1401_s11, %s93_s23  }
  0x43   : > { %s2651_s21 = smov (!%p41_p4, %s40_s21), 4  ;;  %p1591_p5 = pnand %p1154_p11, %p55_p13 }
  0x44   : > { %2559 = sst [smem:[#allocation16_spill]] %s1587_s28  ;;  %s43_s7 = ssub.s32 %s2649_s30, %s2651_s21 }
  0x45   : > { %s1129_s1 = smul.u32 3456, %s2649_s30  ;;  %p44_p6 = scmp.eq.s32.totalorder %s43_s7, 0 }
  0x46   : > { %s145_s23 = scalar_lea.vmem [#allocation3], %s1128_s4  ;;  %s142_s17 = scalar_lea.sflag [#allocation4], %s141_s20 }
  0x47   : > { %s1598_s29 = scalar_lea.hbm %s2512_s0, %s1129_s1  ;;  %s157_s12 = sshll.u32 %s145_s23, 4  ;;  %s1603_s12 = int_to_ptr.vmem [resolvable:$true] %s157_s12 }
  0x48   : > { %s1601_s3 = scalar_select %p44_p6, %s1413_s14, %s46_s8  }
  0x49   : > { %s1277_s28 = scalar_lea.hbm %s1598_s29, 3456  ;;  %p1279_p10 = pneg %p1591_p5 }
  0x4a   : > { %p1278_p8 = scmp.ne.s32.totalorder %s1598_s29, %s1277_s28  ;;  %s1282_s6 = scalar_lea.hbm %s2512_s0, 17280 }
  0x4b   : > { %p1283_p1 = scmp.lt.u32.totalorder %s1598_s29, %s2512_s0  ;;  %p1284_p3 = scmp.lt.u32.totalorder %s1282_s6, %s1277_s28 }
  0x4c   : > { %p1280_p12 = pnand %p1279_p10, %p1278_p8  ;;  %p1286_p9 = scmp.lt.u32.totalorder %s1277_s28, %s1598_s29 }
  0x4d   : > { %p1285_p7 = por %p1284_p3, %p1283_p1 }
  0x4e   : > { %p1281_p0 = pneg %p1280_p12 }
  0x4f   : > { %p1287_p11 = por %p1286_p9, %p1285_p7 }
  0x51   : > { %p1288_p13 = pnand %p1287_p11, %p1281_p0 }
  0x53   : > { %1291 = shalt.err (!%p1288_p13)
}
  0x54   : > { %s1292_s8 = scalar_lea.vmem %s1603_s12, 3456  ;;  %s1436_s20 = smov [#allocation3]  }
  0x55   : > { %p1293_p2 = scmp.ne.s32.totalorder %s1603_s12, %s1292_s8  ;;  %s1297_s4 = sshll.u32 %s1436_s20, 4  ;;  %s1298_s4 = int_to_ptr.vmem [resolvable:$false] %s1297_s4 }
  0x56   : > { %s1299_s7 = scalar_lea.vmem %s1298_s4, 6912  ;;  %p1300_p8 = scmp.lt.s32.totalorder %s1603_s12, %s1298_s4 }
  0x57   : > { %p1295_p4 = pnand %p1293_p2, %p1279_p10  ;;  %p1301_p12 = scmp.lt.s32.totalorder %s1299_s7, %s1292_s8 }
  0x59   : > { %p1296_p6 = pneg %p1295_p4  ;;  %p1302_p1 = por %p1301_p12, %p1300_p8 }
  0x5b   : > { %p1303_p3 = pnand %p1302_p1, %p1296_p6 }
  0x5d   : > { %1306 = shalt.err (!%p1303_p3)
}
  0x5e   : > { %1148 = dma.hbm_to_vmem [thread:$0]  (!%p1591_p5), %s1598_s29, 3456, %s1603_s12, %s142_s17  }
  0x5f   : > { %p2561_p0 = scmp.ne.s32.totalorder %s2554_s27, 0 }
  0x61   : > { %166 = sbr.rel (%p2561_p0) target bundleno = 678 (0x2a6), region = 28 }
  0x68   : > { %s168_s28 = sand.u32 1, %s1409_s13   ;;  %p2562_p10 = scmp.ne.s32.totalorder %s2551_s24, 0 }
  0x69   : > { %s1130_s23 = smul.u32 216, %s168_s28  ;;  %s169_s1 = scalar_lea.sflag [#allocation4], %s168_s28 }
  0x6b   : > { %s1633_s18 = scalar_lea.vmem [#allocation3], %s1130_s23 }
  0x6c   : > { %1380 = dma.done.wait (%p2562_p10), %s169_s1, 3456  }
  0x6d   : > { %1382 = vsyncadd (%p2562_p10), %s169_s1, 4294963840  ;;  %p2563_p7 = scmp.ne.s32.totalorder %s2550_s22, 0 }
  0x6f   : > { %1384 = dma.done.wait (%p2563_p7), [#allocation7], 432  }
  0x70   : > { %1386 = vsyncadd (%p2563_p7), [#allocation7], 4294966864  ;;  %s194_s17 = sand.u32 1, %s1397_s10   ;;  %p1119_p5 = scmp.ne.s32.totalorder %s1417_s15, 0 }
  0x71   : > { %s1646_s27 = sshll.u32 %s194_s17, 3  ;;  %v1437_v0 = vmov (!%p1119_p5), 0.0  }
  0x72   : > { %s196_s5 = scalar_lea.vmem [#allocation8], %s1646_s27  ;;  %204 = sbr.rel (%p1119_p5) target bundleno = 128 (0x80), region = 40  ;;  %205 = vst [vmem:[#allocation2] sm:$0xff] (!%p1119_p5), %v1437_v0  ;;  %206 = vst [vmem:[#allocation2 + $0x8] sm:$0xff] (!%p1119_p5), %v1437_v0 }
  0x73   : > { %207 = vst [vmem:[#allocation2 + $0x10] sm:$0xff] (!%p1119_p5), %v1437_v0  ;;  %208 = vst [vmem:[#allocation2 + $0x18] sm:$0xff] (!%p1119_p5), %v1437_v0 }
  0x74   : > { %209 = vst [vmem:[#allocation2 + $0x20] sm:$0xff] (!%p1119_p5), %v1437_v0  ;;  %210 = vst [vmem:[#allocation2 + $0x28] sm:$0xff] (!%p1119_p5), %v1437_v0 }
  0x75   : > { %211 = vst [vmem:[#allocation2 + $0x30] sm:$0xff] (!%p1119_p5), %v1437_v0  ;;  %212 = vst [vmem:[#allocation2 + $0x38] sm:$0xff] (!%p1119_p5), %v1437_v0 }
  0x76   : > { %213 = vst [vmem:[#allocation2 + $0x40] sm:$0xff] (!%p1119_p5), %v1437_v0  ;;  %214 = vst [vmem:[#allocation2 + $0x48] sm:$0xff] (!%p1119_p5), %v1437_v0 }
  0x77   : > { %215 = vst [vmem:[#allocation2 + $0x50] sm:$0xff] (!%p1119_p5), %v1437_v0  ;;  %216 = vst [vmem:[#allocation2 + $0x58] sm:$0xff] (!%p1119_p5), %v1437_v0 }
  0x78   : > { %217 = vst [vmem:[#allocation2 + $0x60] sm:$0xff] (!%p1119_p5), %v1437_v0  ;;  %218 = vst [vmem:[#allocation2 + $0x68] sm:$0xff] (!%p1119_p5), %v1437_v0 }
  0x79   : > { %219 = vst [vmem:[#allocation2 + $0x70] sm:$0xff] %v1437_v0  ;;  %220 = vst [vmem:[#allocation2 + $0x78] sm:$0xff] %v1437_v0 }
  0x7a   : > { %221 = vst [vmem:[#allocation2 + $0x80] sm:$0xff] %v1437_v0  ;;  %222 = vst [vmem:[#allocation2 + $0x88] sm:$0xff] %v1437_v0 }
  0x7b   : > { %223 = vst [vmem:[#allocation2 + $0x90] sm:$0xff] %v1437_v0  ;;  %224 = vst [vmem:[#allocation2 + $0x98] sm:$0xff] %v1437_v0 }
  0x7c   : > { %225 = vst [vmem:[#allocation2 + $0xa0] sm:$0xff] %v1437_v0  ;;  %226 = vst [vmem:[#allocation2 + $0xa8] sm:$0xff] %v1437_v0 }
  0x7d   : > { %227 = vst [vmem:[#allocation2 + $0xb0] sm:$0xff] %v1437_v0  ;;  %228 = vst [vmem:[#allocation2 + $0xb8] sm:$0xff] %v1437_v0 }
  0x7e   : > { %229 = vst [vmem:[#allocation2 + $0xc0] sm:$0xff] %v1437_v0  ;;  %230 = vst [vmem:[#allocation2 + $0xc8] sm:$0xff] %v1437_v0 }
  0x7f   : > { %231 = vst [vmem:[#allocation2 + $0xd0] sm:$0xff] %v1437_v0 }
  0x80 PF: > { %v1651_v1 = vld [vmem:[%s1633_s18 + $0x10] sm:$0xff]  ;;  %v1654_v2 = vld [vmem:[%s1633_s18] sm:$0xff]  ;;  %s1438_s22 = smov 9   ;;  %v1661_v3 = vld [vmem:[%s1633_s18 + $0x18] sm:$0xff]  ;;  %s1439_s24 = smov 119   ;;  %v317_v28 = vlaneseq }
  0x81   : > { %267 = vrot.lane.b32.xlu1 %v1651_v1, %s1438_s22  ;;  %263 = vrot.lane.b32.xlu0 %v1654_v2, %s1438_s22  ;;  %v1664_v4 = vld [vmem:[%s1633_s18 + $0x8] sm:$0xff]  ;;  %v1674_v6 = vld [vmem:[%s1633_s18 + $0x20] sm:$0xff]  ;;  %s730_s29 = smul.u32 3, %s1421_s16 }
  0x82   : > { %v1671_v5 = vld [vmem:[%s1633_s18 + $0x28] sm:$0xff]  ;;  %v1681_v7 = vld [vmem:[%s1633_s18 + $0x38] sm:$0xff]  ;;  %v1684_v8 = vld [vmem:[%s1633_s18 + $0x30] sm:$0xff]  ;;  %v1843_v29 = vand.u32 127, %v317_v28 }
  0x83   : > { %v1691_v9 = vld [vmem:[%s1633_s18 + $0x48] sm:$0xff]  ;;  %v1694_v10 = vld [vmem:[%s1633_s18 + $0x40] sm:$0xff]  ;;  %v1701_v11 = vld [vmem:[%s1633_s18 + $0x58] sm:$0xff]  ;;  %s731_s12 = sadd.s32 %s1417_s15, %s730_s29 }
  0x84   : > { %v1704_v12 = vld [vmem:[%s1633_s18 + $0x50] sm:$0xff]  ;;  %v1711_v13 = vld [vmem:[%s1633_s18 + $0x68] sm:$0xff]  ;;  %v1714_v14 = vld [vmem:[%s1633_s18 + $0x60] sm:$0xff]  ;;  %s1120_s6 = sshll.u32 %s731_s12, 3  ;;  %vm319_vm0 = vcmp.lt.s32.totalorder %v1843_v29, 9  ;;  %vm428_vm1 = vcmp.lt.s32.totalorder %v1843_v29, 119 }
  0x85   : > { %269 = vrot.lane.b32.xlu1 %v1661_v3, %s1438_s22  ;;  %265 = vrot.lane.b32.xlu0 %v1664_v4, %s1438_s22  ;;  %2564 = vst [vmem:[#allocation17_spill] sm:$0xff] %v1711_v13  ;;  %v1721_v15 = vld [vmem:[%s1633_s18 + $0x78] sm:$0xff]  ;;  %v1724_v16 = vld [vmem:[%s1633_s18 + $0x70] sm:$0xff]  ;;  %s1833_s30 = ssub.s32 40, %s1120_s6 }
  0x86   : > { %v1731_v17 = vld [vmem:[%s1633_s18 + $0x88] sm:$0xff]  ;;  %v1734_v18 = vld [vmem:[%s1633_s18 + $0x80] sm:$0xff]  ;;  %v1741_v19 = vld [vmem:[%s1633_s18 + $0x98] sm:$0xff]  ;;  %p1121_p9 = scmp.lt.s32.totalorder %s1833_s30, 8 }
  0x87   : > { %v1744_v20 = vld [vmem:[%s1633_s18 + $0x90] sm:$0xff]  ;;  %v1751_v21 = vld [vmem:[%s1633_s18 + $0xa8] sm:$0xff]  ;;  %v1754_v22 = vld [vmem:[%s1633_s18 + $0xa0] sm:$0xff] }
  0x88   : > { %2565 = vst [vmem:[#allocation18_spill] sm:$0xff] %v1754_v22  ;;  %v1761_v23 = vld [vmem:[%s1633_s18 + $0xb8] sm:$0xff]  ;;  %v1764_v24 = vld [vmem:[%s1633_s18 + $0xb0] sm:$0xff]  ;;  %v1771_v25 = vld [vmem:[%s1633_s18 + $0xc8] sm:$0xff] }
  0x89   : > { %273 = vrot.lane.b32.xlu1 %v1671_v5, %s1438_s22  ;;  %271 = vrot.lane.b32.xlu0 %v1674_v6, %s1438_s22  ;;  %2566 = vst [vmem:[#allocation19_spill] sm:$0xff] %v1761_v23  ;;  %2567 = vst [vmem:[#allocation20_spill] sm:$0xff] %v1764_v24  ;;  %v1774_v26 = vld [vmem:[%s1633_s18 + $0xc0] sm:$0xff]  ;;  %v1781_v27 = vld [vmem:[%s1633_s18 + $0xd0] sm:$0xff] }
  0x8a   : > { %2568 = vst [vmem:[#allocation21_spill] sm:$0xff] %v1771_v25  ;;  %2569 = vst [vmem:[#allocation22_spill] sm:$0xff] %v1774_v26 }
  0x8b   : > { %2570 = vst [vmem:[#allocation23_spill] sm:$0xff] %v1781_v27 }
  0x8d   : > { %277 = vrot.lane.b32.xlu1 %v1681_v7, %s1438_s22  ;;  %275 = vrot.lane.b32.xlu0 %v1684_v8, %s1438_s22 }
  0x91   : > { %281 = vrot.lane.b32.xlu1 %v1691_v9, %s1438_s22  ;;  %279 = vrot.lane.b32.xlu0 %v1694_v10, %s1438_s22 }
  0x95   : > { %285 = vrot.lane.b32.xlu1 %v1701_v11, %s1438_s22  ;;  %283 = vrot.lane.b32.xlu0 %v1704_v12, %s1438_s22 }
  0x99   : > { %289 = vrot.lane.b32.xlu1 %v1711_v13, %s1438_s22  ;;  %287 = vrot.lane.b32.xlu0 %v1714_v14, %s1438_s22 }
  0x9d   : > { %293 = vrot.lane.b32.xlu1 %v1721_v15, %s1438_s22  ;;  %291 = vrot.lane.b32.xlu0 %v1724_v16, %s1438_s22 }
  0xa1   : > { %297 = vrot.lane.b32.xlu1 %v1731_v17, %s1438_s22  ;;  %295 = vrot.lane.b32.xlu0 %v1734_v18, %s1438_s22 }
  0xa5   : > { %301 = vrot.lane.b32.xlu1 %v1741_v19, %s1438_s22  ;;  %299 = vrot.lane.b32.xlu0 %v1744_v20, %s1438_s22 }
  0xa9   : > { %305 = vrot.lane.b32.xlu1 %v1751_v21, %s1438_s22  ;;  %303 = vrot.lane.b32.xlu0 %v1754_v22, %s1438_s22 }
  0xad   : > { %309 = vrot.lane.b32.xlu1 %v1761_v23, %s1438_s22  ;;  %307 = vrot.lane.b32.xlu0 %v1764_v24, %s1438_s22 }
  0xb1   : > { %313 = vrot.lane.b32.xlu1 %v1771_v25, %s1438_s22  ;;  %311 = vrot.lane.b32.xlu0 %v1774_v26, %s1438_s22 }
  0xb5   : > { %374 = vrot.lane.b32.xlu1 %v1654_v2, %s1439_s24  ;;  %315 = vrot.lane.b32.xlu0 %v1781_v27, %s1438_s22 }
  0xb9   : > { %378 = vrot.lane.b32.xlu1 %v1651_v1, %s1439_s24  ;;  %376 = vrot.lane.b32.xlu0 %v1664_v4, %s1439_s24 }
  0xbd   : > { %382 = vrot.lane.b32.xlu1 %v1674_v6, %s1439_s24  ;;  %380 = vrot.lane.b32.xlu0 %v1661_v3, %s1439_s24 }
  0xc1   : > { %386 = vrot.lane.b32.xlu1 %v1684_v8, %s1439_s24  ;;  %384 = vrot.lane.b32.xlu0 %v1671_v5, %s1439_s24 }
  0xc5   : > { %390 = vrot.lane.b32.xlu1 %v1694_v10, %s1439_s24  ;;  %388 = vrot.lane.b32.xlu0 %v1681_v7, %s1439_s24 }
  0xc9   : > { %394 = vrot.lane.b32.xlu1 %v1704_v12, %s1439_s24  ;;  %392 = vrot.lane.b32.xlu0 %v1691_v9, %s1439_s24 }
  0xcd   : > { %398 = vrot.lane.b32.xlu1 %v1714_v14, %s1439_s24  ;;  %396 = vrot.lane.b32.xlu0 %v1701_v11, %s1439_s24 }
  0xd1   : > { %402 = vrot.lane.b32.xlu1 %v1724_v16, %s1439_s24  ;;  %400 = vrot.lane.b32.xlu0 %v1711_v13, %s1439_s24 }
  0xd5   : > { %406 = vrot.lane.b32.xlu1 %v1734_v18, %s1439_s24  ;;  %404 = vrot.lane.b32.xlu0 %v1721_v15, %s1439_s24 }
  0xd9   : > { %410 = vrot.lane.b32.xlu1 %v1744_v20, %s1439_s24  ;;  %408 = vrot.lane.b32.xlu0 %v1731_v17, %s1439_s24 }
  0xdd   : > { %414 = vrot.lane.b32.xlu1 %v1754_v22, %s1439_s24  ;;  %412 = vrot.lane.b32.xlu0 %v1741_v19, %s1439_s24 }
  0xe1   : > { %418 = vrot.lane.b32.xlu1 %v1764_v24, %s1439_s24  ;;  %416 = vrot.lane.b32.xlu0 %v1751_v21, %s1439_s24 }
  0xe5   : > { %422 = vrot.lane.b32.xlu1 %v1774_v26, %s1439_s24  ;;  %420 = vrot.lane.b32.xlu0 %v1761_v23, %s1439_s24  ;;  %v1969_v26 = vmul.f32 %v1674_v6, %v1674_v6 }
  0xe9   : > { %426 = vrot.lane.b32.xlu1 %v1781_v27, %s1439_s24  ;;  %424 = vrot.lane.b32.xlu0 %v1771_v25, %s1439_s24 }
  0xf3   : > { %v268_v30 = vpop.permute.xlu1 %267  ;;  %v264_v31 = vpop.permute.xlu0 %263 }
  0xf7   : > { %v270_v32 = vpop.permute.xlu1 %269  ;;  %v266_v33 = vpop.permute.xlu0 %265 }
  0xf8   : > { %v1848_v34 = vsel %vm319_vm0, %v268_v30, %v270_v32  ;;  %v1852_v35 = vsel %vm319_vm0, %v266_v33, %v268_v30  ;;  %v345_v36 = vsel %vm319_vm0, %v264_v31, %v266_v33 }
  0xfb   : > { %v274_v37 = vpop.permute.xlu1 %273  ;;  %v272_v38 = vpop.permute.xlu0 %271 }
  0xfc   : > { %v1858_v39 = vsel %vm319_vm0, %v272_v38, %v274_v37  ;;  %v1862_v40 = vsel %vm319_vm0, %v270_v32, %v272_v38 }
  0xff   : > { %v278_v41 = vpop.permute.xlu1 %277  ;;  %v276_v42 = vpop.permute.xlu0 %275 }
 0x100   : > { %v1866_v43 = vsel %vm319_vm0, %v276_v42, %v278_v41  ;;  %v1870_v44 = vsel %vm319_vm0, %v274_v37, %v276_v42 }
 0x103   : > { %v282_v45 = vpop.permute.xlu1 %281  ;;  %v280_v46 = vpop.permute.xlu0 %279 }
 0x104   : > { %v1874_v47 = vsel %vm319_vm0, %v280_v46, %v282_v45  ;;  %v1878_v48 = vsel %vm319_vm0, %v278_v41, %v280_v46 }
 0x107   : > { %v286_v49 = vpop.permute.xlu1 %285  ;;  %v284_v50 = vpop.permute.xlu0 %283 }
 0x108   : > { %v1882_v51 = vsel %vm319_vm0, %v284_v50, %v286_v49  ;;  %v1886_v52 = vsel %vm319_vm0, %v282_v45, %v284_v50  ;;  %v1935_v50 = vshrl.u32 %v317_v28, 7 }
 0x10a   : > { %2586 = vst [vmem:[#allocation39_spill] sm:$0xff] %v1935_v50  ;;  %v1962_v25 = vsub.s32 0, %v1935_v50  ;;  %v1965_v27 = vsub.s32 1, %v1935_v50  ;;  %v2004_v24 = vsub.s32 3, %v1935_v50 }
 0x10b   : > { %v290_v53 = vpop.permute.xlu1 %289  ;;  %v288_v54 = vpop.permute.xlu0 %287 }
 0x10c   : > { %v1890_v55 = vsel %vm319_vm0, %v288_v54, %v290_v53  ;;  %v1894_v56 = vsel %vm319_vm0, %v286_v49, %v288_v54 }
 0x10d   : > { %2571 = vst [vmem:[#allocation24_spill] sm:$0xff] %v1890_v55  ;;  %2572 = vst [vmem:[#allocation25_spill] sm:$0xff] %v1894_v56 }
 0x10f   : > { %v294_v57 = vpop.permute.xlu1 %293  ;;  %v292_v58 = vpop.permute.xlu0 %291 }
 0x110   : > { %v1898_v59 = vsel %vm319_vm0, %v292_v58, %v294_v57  ;;  %v1902_v60 = vsel %vm319_vm0, %v290_v53, %v292_v58  ;;  %v1939_v53 = vmul.f32 %v1651_v1, %v1651_v1  ;;  %v483_v58 = vmul.f32 %v1654_v2, %v1654_v2 }
 0x111   : > { %2573 = vst [vmem:[#allocation26_spill] sm:$0xff] %v1898_v59  ;;  %2574 = vst [vmem:[#allocation27_spill] sm:$0xff] %v1902_v60  ;;  %v2022_v59 = vsub.s32 5, %v1935_v50  ;;  %v350_v60 = vadd.f32 %v1848_v34, %v1661_v3 }
 0x113   : > { %v298_v61 = vpop.permute.xlu1 %297  ;;  %v296_v62 = vpop.permute.xlu0 %295 }
 0x114   : > { %v1906_v63 = vsel %vm319_vm0, %v296_v62, %v298_v61  ;;  %v1910_v0 = vsel %vm319_vm0, %v294_v57, %v296_v62  ;;  %v484_v62 = vmul.f32 %v1664_v4, %v1664_v4 }
 0x115   : > { %2575 = vst [vmem:[#allocation28_spill] sm:$0xff] %v1906_v63  ;;  %2576 = vst [vmem:[#allocation29_spill] sm:$0xff] %v1910_v0  ;;  %v2001_v0 = vsub.s32 2, %v1935_v50 }
 0x117   : > { %v1912_v30 = vpop.permute.xlu1 %301  ;;  %v300_v32 = vpop.permute.xlu0 %299 }
 0x118   : > { %2577 = vst [vmem:[#allocation30_spill] sm:$0xff] %v1912_v30  ;;  %v1917_v33 = vsel %vm319_vm0, %v300_v32, %v1912_v30  ;;  %v1921_v37 = vsel %vm319_vm0, %v298_v61, %v300_v32  ;;  %v1949_v61 = vmul.f32 %v1661_v3, %v1661_v3  ;;  %v1958_v32 = vmul.f32 %v1671_v5, %v1671_v5 }
 0x119   : > { %2578 = vst [vmem:[#allocation31_spill] sm:$0xff] %v1917_v33  ;;  %2579 = vst [vmem:[#allocation32_spill] sm:$0xff] %v1921_v37  ;;  %v348_v30 = vadd.f32 %v345_v36, %v1664_v4 }
 0x11b   : > { %v1923_v38 = vpop.permute.xlu1 %305  ;;  %v1925_v41 = vpop.permute.xlu0 %303 }
 0x11c   : > { %2580 = vst [vmem:[#allocation33_spill] sm:$0xff] %v1923_v38  ;;  %2581 = vst [vmem:[#allocation34_spill] sm:$0xff] %v1925_v41 }
 0x11f   : > { %v1927_v42 = vpop.permute.xlu1 %309  ;;  %v1929_v45 = vpop.permute.xlu0 %307 }
 0x120   : > { %2582 = vst [vmem:[#allocation35_spill] sm:$0xff] %v1927_v42  ;;  %2583 = vst [vmem:[#allocation36_spill] sm:$0xff] %v1929_v45  ;;  %v1987_v45 = vmul.f32 %v1694_v10, %v1694_v10  ;;  %v1991_v42 = vmul.f32 %v1701_v11, %v1701_v11 }
 0x122   : > { %2590 = vst [vmem:[#allocation43_spill] sm:$0xff] %v1987_v45  ;;  %2591 = vst [vmem:[#allocation44_spill] sm:$0xff] %v1991_v42  ;;  %v2012_v42 = vmul.f32 %v1704_v12, %v1704_v12 }
 0x123   : > { %v1931_v46 = vpop.permute.xlu1 %313  ;;  %v1933_v49 = vpop.permute.xlu0 %311 }
 0x124   : > { %2584 = vst [vmem:[#allocation37_spill] sm:$0xff] %v1931_v46  ;;  %2585 = vst [vmem:[#allocation38_spill] sm:$0xff] %v1933_v49  ;;  %v1973_v46 = vmul.f32 %v1681_v7, %v1681_v7  ;;  %v1983_v49 = vld [vmem:[#allocation6] sm:$0xff] }
 0x125   : > { %v544_v4 = vrot.slane %v1983_v49, %v1962_v25  ;;  %2592 = vst [vmem:[#allocation45_spill] sm:$0xff] %v2012_v42  ;;  %v552_v23 = vrot.slane %v1983_v49, %v2001_v0  ;;  %v564_v55 = vrot.slane %v1983_v49, %v2022_v59 }
 0x127   : > { %v1941_v54 = vpop.permute.xlu1 %374  ;;  %v1943_v57 = vpop.permute.xlu0 %315 }
 0x128   : > { %2587 = vst [vmem:[#allocation40_spill] sm:$0xff] %v1941_v54  ;;  %2588 = vst [vmem:[#allocation41_spill] sm:$0xff] %v1943_v57  ;;  %v346_v28 = vsel %vm319_vm0, %v1943_v57, %v264_v31  ;;  %v1977_v31 = vmul.f32 %v1684_v8, %v1684_v8  ;;  %v1981_v57 = vmul.f32 %v1691_v9, %v1691_v9 }
 0x129   : > { %v347_v41 = vadd.f32 %v346_v28, %v1654_v2  ;;  %v548_v2 = vrot.slane %v1983_v49, %v1965_v27 }
 0x12a   : > { %2589 = vst [vmem:[#allocation42_spill] sm:$0xff] %v1981_v57 }
 0x12b   : > { %v379_v38 = vpop.permute.xlu1 %378  ;;  %v377_v33 = vpop.permute.xlu0 %376 }
 0x12c   : > { %v453_v37 = vsel %vm428_vm1, %v377_v33, %v379_v38  ;;  %v454_v63 = vsel %vm428_vm1, %v1941_v54, %v377_v33  ;;  %v2016_v33 = vmul.f32 %v1711_v13, %v1711_v13  ;;  %v2019_v54 = vsub.s32 4, %v1935_v50 }
 0x12d   : > { %v456_v36 = vadd.f32 %v454_v63, %v347_v41  ;;  %v457_v28 = vadd.f32 %v453_v37, %v348_v30  ;;  %v349_v63 = vadd.f32 %v1852_v35, %v1651_v1  ;;  %v351_v35 = vadd.f32 %v1862_v40, %v1674_v6 }
 0x12e   : > { %2593 = vst [vmem:[#allocation46_spill] sm:$0xff] %v2016_v33  ;;  %v556_v33 = vrot.slane %v1983_v49, %v2004_v24  ;;  %v2056_v40 = vsub.s32 7, %v1935_v50 }
 0x12f   : > { %v510_v30 = vmul.f32 %v456_v36, %v456_v36  ;;  %v511_v37 = vmul.f32 %v457_v28, %v457_v28  ;;  %v383_v41 = vpop.permute.xlu1 %382  ;;  %v381_v42 = vpop.permute.xlu0 %380  ;;  %v352_v36 = vadd.f32 %v1858_v39, %v1671_v5  ;;  %v560_v28 = vrot.slane %v1983_v49, %v2019_v54 }
 0x130   : > { %v451_v22 = vsel %vm428_vm1, %v381_v42, %v383_v41  ;;  %v452_v57 = vsel %vm428_vm1, %v379_v38, %v381_v42  ;;  %v2053_v39 = vsub.s32 6, %v1935_v50 }
 0x131   : > { %v676_v3 = vmul.f32 %v544_v4, %v510_v30  ;;  %v677_v34 = vmul.f32 %v548_v2, %v511_v37  ;;  %v458_v45 = vadd.f32 %v452_v57, %v349_v63  ;;  %v459_v1 = vadd.f32 %v451_v22, %v350_v60 }
 0x132   : > { %v2064_v2 = vmul.f32 %v1721_v15, %v1721_v15  ;;  %v353_v63 = vadd.f32 %v1870_v44, %v1684_v8  ;;  %v354_v30 = vadd.f32 %v1866_v43, %v1681_v7 }
 0x133   : > { %v2044_v13 = vsub.f32 %v483_v58, %v676_v3  ;;  %v2046_v56 = vsub.f32 %v484_v62, %v677_v34  ;;  %v512_v38 = vmul.f32 %v458_v45, %v458_v45  ;;  %v513_v42 = vmul.f32 %v459_v1, %v459_v1  ;;  %v387_v57 = vpop.permute.xlu1 %386  ;;  %v385_v22 = vpop.permute.xlu0 %384 }
 0x134   : > { %v449_v6 = vsel %vm428_vm1, %v385_v22, %v387_v57  ;;  %v450_v5 = vsel %vm428_vm1, %v383_v41, %v385_v22  ;;  %v2060_v45 = vmul.f32 %v1714_v14, %v1714_v14  ;;  %v568_v1 = vrot.slane %v1983_v49, %v2053_v39 }
 0x135   : > { %v678_v60 = vmul.f32 %v552_v23, %v512_v38  ;;  %v679_v58 = vmul.f32 %v556_v33, %v513_v42  ;;  %v460_v62 = vadd.f32 %v450_v5, %v351_v35  ;;  %v461_v4 = vadd.f32 %v449_v6, %v352_v36  ;;  %v2084_v36 = vld [vmem:[#allocation6 + $0x8] sm:$0xff] }
 0x136   : > { %v572_v35 = vrot.slane %v1983_v49, %v2056_v40  ;;  %v2088_v38 = vmul.f32 %v1724_v16, %v1724_v16  ;;  %v2092_v42 = vmul.f32 %v1731_v17, %v1731_v17  ;;  %v355_v49 = vadd.f32 %v1878_v48, %v1694_v10 }
 0x137   : > { %v2071_v37 = vsub.f32 %v1939_v53, %v678_v60  ;;  %v2074_v23 = vsub.f32 %v1949_v61, %v679_v58  ;;  %v514_v33 = vmul.f32 %v460_v62, %v460_v62  ;;  %v515_v41 = vmul.f32 %v461_v4, %v461_v4  ;;  %v391_v3 = vpop.permute.xlu1 %390  ;;  %v389_v34 = vpop.permute.xlu0 %388 }
 0x138   : > { %v447_v8 = vsel %vm428_vm1, %v389_v34, %v391_v3  ;;  %v448_v7 = vsel %vm428_vm1, %v387_v57, %v389_v34  ;;  %v356_v57 = vadd.f32 %v1874_v47, %v1691_v9  ;;  %v576_v58 = vrot.slane %v2084_v36, %v1962_v25 }
 0x139   : > { %v680_v43 = vmul.f32 %v560_v28, %v514_v33  ;;  %v681_v44 = vmul.f32 %v564_v55, %v515_v41  ;;  %v462_v53 = vadd.f32 %v448_v7, %v353_v63  ;;  %v463_v61 = vadd.f32 %v447_v8, %v354_v30 }
 0x13a   : > { %v580_v62 = vrot.slane %v2084_v36, %v1965_v27  ;;  %v2114_v4 = vmul.f32 %v1734_v18, %v1734_v18  ;;  %v2118_v63 = vmul.f32 %v1741_v19, %v1741_v19  ;;  %v357_v30 = vadd.f32 %v1886_v52, %v1704_v12 }
 0x13b   : > { %v2099_v55 = vsub.f32 %v1969_v26, %v680_v43  ;;  %v2102_v28 = vsub.f32 %v1958_v32, %v681_v44  ;;  %v516_v22 = vmul.f32 %v462_v53, %v462_v53  ;;  %v517_v6 = vmul.f32 %v463_v61, %v463_v61  ;;  %v395_v5 = vpop.permute.xlu1 %394  ;;  %v393_v60 = vpop.permute.xlu0 %392  ;;  %v2594_v61 = vld [vmem:[#allocation25_spill] sm:$0xff] }
 0x13c   : > { %v445_v10 = vsel %vm428_vm1, %v393_v60, %v395_v5  ;;  %v446_v9 = vsel %vm428_vm1, %v391_v3, %v393_v60  ;;  %v358_v33 = vadd.f32 %v1882_v51, %v1701_v11  ;;  %v584_v7 = vrot.slane %v2084_v36, %v2001_v0  ;;  %v2597_v60 = vld [vmem:[#allocation43_spill] sm:$0xff] }
 0x13d   : > { %v682_v26 = vmul.f32 %v568_v1, %v516_v22  ;;  %v683_v47 = vmul.f32 %v572_v35, %v517_v6  ;;  %v464_v48 = vadd.f32 %v446_v9, %v355_v49  ;;  %v465_v32 = vadd.f32 %v445_v10, %v356_v57  ;;  %v2595_v57 = vld [vmem:[#allocation17_spill] sm:$0xff]  ;;  %v2596_v22 = vld [vmem:[#allocation24_spill] sm:$0xff] }
 0x13e   : > { %v588_v43 = vrot.slane %v2084_v36, %v2004_v24  ;;  %v2140_v44 = vmul.f32 %v1744_v20, %v1744_v20  ;;  %v2144_v53 = vmul.f32 %v1751_v21, %v1751_v21  ;;  %v359_v49 = vadd.f32 %v2594_v61, %v1714_v14  ;;  %v2602_v61 = vld [vmem:[#allocation26_spill] sm:$0xff] }
 0x13f   : > { %v2125_v41 = vsub.f32 %v1977_v31, %v682_v26  ;;  %v2128_v3 = vsub.f32 %v1973_v46, %v683_v47  ;;  %v518_v34 = vmul.f32 %v464_v48, %v464_v48  ;;  %v519_v1 = vmul.f32 %v465_v32, %v465_v32  ;;  %v399_v35 = vpop.permute.xlu1 %398  ;;  %v397_v8 = vpop.permute.xlu0 %396 }
 0x140   : > { %v443_v12 = vsel %vm428_vm1, %v397_v8, %v399_v35  ;;  %v444_v11 = vsel %vm428_vm1, %v395_v5, %v397_v8  ;;  %v360_v6 = vadd.f32 %v2596_v22, %v2595_v57  ;;  %v592_v48 = vrot.slane %v2084_v36, %v2019_v54  ;;  %v2603_v22 = vld [vmem:[#allocation45_spill] sm:$0xff] }
 0x141   : > { %v684_v51 = vmul.f32 %v576_v58, %v518_v34  ;;  %v685_v52 = vmul.f32 %v580_v62, %v519_v1  ;;  %v466_v46 = vadd.f32 %v444_v11, %v357_v30  ;;  %v467_v31 = vadd.f32 %v443_v12, %v358_v33  ;;  %v2598_v58 = vld [vmem:[#allocation42_spill] sm:$0xff] }
 0x142   : > { %v596_v32 = vrot.slane %v2084_v36, %v2022_v59  ;;  %v2599_v12 = vld [vmem:[#allocation18_spill] sm:$0xff]  ;;  %v362_v57 = vadd.f32 %v2602_v61, %v1721_v15 }
 0x143   : > { %v2151_v5 = vsub.f32 %v2597_v60, %v684_v51  ;;  %v2154_v62 = vsub.f32 %v2598_v58, %v685_v52  ;;  %v520_v10 = vmul.f32 %v466_v46, %v466_v46  ;;  %v521_v9 = vmul.f32 %v467_v31, %v467_v31  ;;  %v403_v26 = vpop.permute.xlu1 %402  ;;  %v401_v47 = vpop.permute.xlu0 %400  ;;  %v2600_v51 = vld [vmem:[#allocation19_spill] sm:$0xff] }
 0x144   : > { %v441_v14 = vsel %vm428_vm1, %v401_v47, %v403_v26  ;;  %v442_v30 = vsel %vm428_vm1, %v399_v35, %v401_v47  ;;  %v2166_v11 = vmul.f32 %v2599_v12, %v2599_v12  ;;  %v2170_v52 = vmul.f32 %v2600_v51, %v2600_v51  ;;  %v2601_v46 = vld [vmem:[#allocation27_spill] sm:$0xff] }
 0x145   : > { %v686_v33 = vmul.f32 %v584_v7, %v520_v10  ;;  %v687_v34 = vmul.f32 %v588_v43, %v521_v9  ;;  %v468_v1 = vadd.f32 %v442_v30, %v359_v49  ;;  %v469_v8 = vadd.f32 %v441_v14, %v360_v6  ;;  %v2604_v7 = vld [vmem:[#allocation44_spill] sm:$0xff]  ;;  %v2182_v10 = vld [vmem:[#allocation6 + $0x10] sm:$0xff] }
 0x146   : > { %v361_v31 = vadd.f32 %v2601_v46, %v1724_v16  ;;  %v600_v9 = vrot.slane %v2084_v36, %v2053_v39  ;;  %v604_v16 = vrot.slane %v2084_v36, %v2056_v40  ;;  %v2606_v46 = vld [vmem:[#allocation29_spill] sm:$0xff] }
 0x147   : > { %v2177_v35 = vsub.f32 %v2603_v22, %v686_v33  ;;  %v2180_v43 = vsub.f32 %v2604_v7, %v687_v34  ;;  %v522_v49 = vmul.f32 %v468_v1, %v468_v1  ;;  %v523_v6 = vmul.f32 %v469_v8, %v469_v8  ;;  %v407_v60 = vpop.permute.xlu1 %406  ;;  %v405_v58 = vpop.permute.xlu0 %404  ;;  %v2605_v1 = vld [vmem:[#allocation20_spill] sm:$0xff] }
 0x148   : > { %v439_v15 = vsel %vm428_vm1, %v405_v58, %v407_v60  ;;  %v440_v47 = vsel %vm428_vm1, %v403_v26, %v405_v58  ;;  %v2194_v8 = vmul.f32 %v2605_v1, %v2605_v1  ;;  %v363_v61 = vadd.f32 %v2606_v46, %v1734_v18  ;;  %v2607_v22 = vld [vmem:[#allocation28_spill] sm:$0xff]  ;;  %v2608_v26 = vld [vmem:[#allocation46_spill] sm:$0xff] }
 0x149   : > { %v688_v14 = vmul.f32 %v592_v48, %v522_v49  ;;  %v689_v30 = vmul.f32 %v596_v32, %v523_v6  ;;  %v470_v33 = vadd.f32 %v440_v47, %v361_v31  ;;  %v471_v34 = vadd.f32 %v439_v15, %v362_v57 }
 0x14a   : > { %v364_v36 = vadd.f32 %v2607_v22, %v1731_v17  ;;  %v608_v7 = vrot.slane %v2182_v10, %v1962_v25  ;;  %v612_v6 = vrot.slane %v2182_v10, %v1965_v27  ;;  %v2612_v22 = vld [vmem:[#allocation33_spill] sm:$0xff] }
 0x14b   : > { %v2203_v50 = vsub.f32 %v2060_v45, %v688_v14  ;;  %v2206_v48 = vsub.f32 %v2608_v26, %v689_v30  ;;  %v524_v32 = vmul.f32 %v470_v33, %v470_v33  ;;  %v525_v31 = vmul.f32 %v471_v34, %v471_v34  ;;  %v411_v57 = vpop.permute.xlu1 %410  ;;  %v409_v49 = vpop.permute.xlu0 %408  ;;  %v2610_v30 = vld [vmem:[#allocation32_spill] sm:$0xff]  ;;  %v2611_v34 = vld [vmem:[#allocation31_spill] sm:$0xff]  ;;  %v2613_v26 = vld [vmem:[#allocation34_spill] sm:$0xff] }
 0x14c   : > { %v437_v18 = vsel %vm428_vm1, %v409_v49, %v411_v57  ;;  %v438_v17 = vsel %vm428_vm1, %v407_v60, %v409_v49  ;;  %v616_v45 = vrot.slane %v2182_v10, %v2001_v0  ;;  %v365_v33 = vadd.f32 %v2610_v30, %v1744_v20  ;;  %v2614_v60 = vld [vmem:[#allocation30_spill] sm:$0xff]  ;;  %v2615_v30 = vld [vmem:[#allocation35_spill] sm:$0xff] }
 0x14d   : > { %2609 = vst [vmem:[#allocation25_spill] sm:$0xff] %v2206_v48  ;;  %v690_v58 = vmul.f32 %v600_v9, %v524_v32  ;;  %v691_v15 = vmul.f32 %v604_v16, %v525_v31  ;;  %v472_v47 = vadd.f32 %v438_v17, %v363_v61  ;;  %v473_v14 = vadd.f32 %v437_v18, %v364_v36 }
 0x14e   : > { %v366_v46 = vadd.f32 %v2611_v34, %v1741_v19  ;;  %v325_v48 = vsel %vm319_vm0, %v2613_v26, %v2612_v22  ;;  %v326_v49 = vsel %vm319_vm0, %v2614_v60, %v2613_v26  ;;  %v620_v32 = vrot.slane %v2182_v10, %v2004_v24  ;;  %v2616_v34 = vld [vmem:[#allocation36_spill] sm:$0xff] }
 0x14f   : > { %v2229_v9 = vsub.f32 %v2088_v38, %v690_v58  ;;  %v2232_v16 = vsub.f32 %v2064_v2, %v691_v15  ;;  %v526_v20 = vmul.f32 %v472_v47, %v472_v47  ;;  %v527_v61 = vmul.f32 %v473_v14, %v473_v14  ;;  %v415_v36 = vpop.permute.xlu1 %414  ;;  %v413_v19 = vpop.permute.xlu0 %412 }
 0x150   : > { %v435_v31 = vsel %vm428_vm1, %v413_v19, %v415_v36  ;;  %v436_v18 = vsel %vm428_vm1, %v411_v57, %v413_v19  ;;  %v624_v38 = vrot.slane %v2182_v10, %v2019_v54  ;;  %v367_v47 = vadd.f32 %v326_v49, %v2599_v12  ;;  %v2617_v19 = vld [vmem:[#allocation38_spill] sm:$0xff] }
 0x151   : > { %v692_v17 = vmul.f32 %v608_v7, %v526_v20  ;;  %v693_v58 = vmul.f32 %v612_v6, %v527_v61  ;;  %v474_v2 = vadd.f32 %v436_v18, %v365_v33  ;;  %v475_v15 = vadd.f32 %v435_v31, %v366_v46  ;;  %v2618_v31 = vld [vmem:[#allocation41_spill] sm:$0xff] }
 0x152   : > { %v368_v14 = vadd.f32 %v325_v48, %v1751_v21  ;;  %v323_v24 = vsel %vm319_vm0, %v2616_v34, %v2615_v30  ;;  %v324_v57 = vsel %vm319_vm0, %v2612_v22, %v2616_v34  ;;  %v628_v48 = vrot.slane %v2182_v10, %v2022_v59  ;;  %v2619_v18 = vld [vmem:[#allocation37_spill] sm:$0xff] }
 0x153   : > { %v2253_v54 = vsub.f32 %v2114_v4, %v692_v17  ;;  %v2256_v7 = vsub.f32 %v2092_v42, %v693_v58  ;;  %v528_v6 = vmul.f32 %v474_v2, %v474_v2  ;;  %v529_v12 = vmul.f32 %v475_v15, %v475_v15  ;;  %v419_v33 = vpop.permute.xlu1 %418  ;;  %v417_v21 = vpop.permute.xlu0 %416  ;;  %v262_v58 = vld [vmem:[#allocation6 + $0x18] sm:$0x7] }
 0x154   : > { %v433_v46 = vsel %vm428_vm1, %v417_v21, %v419_v33  ;;  %v434_v26 = vsel %vm428_vm1, %v415_v36, %v417_v21  ;;  %v632_v4 = vrot.slane %v2182_v10, %v2053_v39  ;;  %v369_v20 = vadd.f32 %v324_v57, %v2605_v1 }
 0x155   : > { %v694_v22 = vmul.f32 %v616_v45, %v528_v6  ;;  %v695_v60 = vmul.f32 %v620_v32, %v529_v12  ;;  %v476_v42 = vadd.f32 %v434_v26, %v367_v47  ;;  %v477_v49 = vadd.f32 %v433_v46, %v368_v14  ;;  %v2621_v6 = vld [vmem:[#allocation23_spill] sm:$0xff] }
 0x156   : > { %v370_v61 = vadd.f32 %v323_v24, %v2600_v51  ;;  %v322_v59 = vsel %vm319_vm0, %v2615_v30, %v2617_v19  ;;  %v320_v36 = vsel %vm319_vm0, %v2619_v18, %v2618_v31  ;;  %v321_v2 = vsel %vm319_vm0, %v2617_v19, %v2619_v18  ;;  %v2620_v24 = vld [vmem:[#allocation22_spill] sm:$0xff] }
 0x157   : > { %v2277_v39 = vsub.f32 %v2140_v44, %v694_v22  ;;  %v2280_v45 = vsub.f32 %v2118_v63, %v695_v60  ;;  %v530_v32 = vmul.f32 %v476_v42, %v476_v42  ;;  %v531_v1 = vmul.f32 %v477_v49, %v477_v49  ;;  %v423_v17 = vpop.permute.xlu1 %422  ;;  %v421_v51 = vpop.permute.xlu0 %420  ;;  %v2622_v22 = vld [vmem:[#allocation21_spill] sm:$0xff]  ;;  %v2623_v42 = vld [vmem:[#allocation40_spill] sm:$0xff] }
 0x158   : > { %v636_v15 = vrot.slane %v2182_v10, %v2056_v40  ;;  %v431_v44 = vsel %vm428_vm1, %v421_v51, %v423_v17  ;;  %v432_v63 = vsel %vm428_vm1, %v419_v33, %v421_v51  ;;  %v371_v57 = vadd.f32 %v322_v59, %v2620_v24 }
 0x159   : > { %v696_v47 = vmul.f32 %v624_v38, %v530_v32  ;;  %v697_v14 = vmul.f32 %v628_v48, %v531_v1  ;;  %v478_v30 = vadd.f32 %v432_v63, %v369_v20  ;;  %v479_v34 = vadd.f32 %v431_v44, %v370_v61 }
 0x15a   : > { %v373_v12 = vadd.f32 %v320_v36, %v2621_v6  ;;  %v648_v21 = vrot.slane %v262_v58, %v2001_v0  ;;  %v640_v46 = vrot.slane %v262_v58, %v1962_v25  ;;  %v372_v60 = vadd.f32 %v321_v2, %v2622_v22 }
 0x15b   : > { %v2297_v40 = vsub.f32 %v2166_v11, %v696_v47  ;;  %v2300_v10 = vsub.f32 %v2144_v53, %v697_v14  ;;  %v532_v26 = vmul.f32 %v478_v30, %v478_v30  ;;  %v533_v33 = vmul.f32 %v479_v34, %v479_v34  ;;  %v427_v38 = vpop.permute.xlu1 %426  ;;  %v425_v48 = vpop.permute.xlu0 %424  ;;  %v741_v34 = vld [vmem:[#allocation2 + $0x18] sm:$0xff] (!%p1121_p9) }
 0x15c   : > { %v455_v49 = vsel %vm428_vm1, %v427_v38, %v2623_v42  ;;  %v429_v0 = vsel %vm428_vm1, %v425_v48, %v427_v38  ;;  %v430_v25 = vsel %vm428_vm1, %v423_v17, %v425_v48  ;;  %v507_v19 = vmul.f32 %v2620_v24, %v2620_v24  ;;  %v742_v24 = vld [vmem:[#allocation2 + $0x20] sm:$0xff] (!%p1121_p9)  ;;  %v748_v42 = vld [vmem:[#allocation2 + $0x50] sm:$0xff] (!%p1121_p9) }
 0x15d   : > { %v698_v11 = vmul.f32 %v632_v4, %v532_v26  ;;  %v699_v20 = vmul.f32 %v636_v15, %v533_v33  ;;  %v482_v53 = vadd.f32 %v455_v49, %v373_v12  ;;  %v480_v61 = vadd.f32 %v430_v25, %v371_v57  ;;  %v743_v57 = vld [vmem:[#allocation2 + $0x28] sm:$0xff] (!%p1121_p9)  ;;  %v745_v26 = vld [vmem:[#allocation2 + $0x38] sm:$0xff] (!%p1121_p9)  ;;  %v746_v33 = vld [vmem:[#allocation2 + $0x40] sm:$0xff] (!%p1121_p9) }
 0x15e   : > { %v509_v59 = vmul.f32 %v2621_v6, %v2621_v6  ;;  %v644_v31 = vrot.slane %v262_v58, %v1965_v27  ;;  %v481_v18 = vadd.f32 %v429_v0, %v372_v60  ;;  %v508_v1 = vmul.f32 %v2622_v22, %v2622_v22  ;;  %737 = sbr.rel (%p1121_p9) target bundleno = 368 (0x170), region = 44  ;;  %v740_v58 = vld [vmem:[#allocation2 + $0x10] sm:$0xff] (!%p1121_p9)  ;;  %v747_v60 = vld [vmem:[#allocation2 + $0x48] sm:$0xff] (!%p1121_p9)  ;;  %v749_v49 = vld [vmem:[#allocation2 + $0x58] sm:$0xff] (!%p1121_p9) }
 0x15f   : > { %v2316_v36 = vsub.f32 %v2194_v8, %v698_v11  ;;  %v2319_v32 = vsub.f32 %v2170_v52, %v699_v20  ;;  %v536_v29 = vmul.f32 %v482_v53, %v482_v53  ;;  %v534_v4 = vmul.f32 %v480_v61, %v480_v61  ;;  %v738_v52 = vld [vmem:[#allocation2] sm:$0xff] (!%p1121_p9)  ;;  %v739_v8 = vld [vmem:[#allocation2 + $0x8] sm:$0xff] (!%p1121_p9)  ;;  %v752_v61 = vld [vmem:[#allocation2 + $0x70] sm:$0xff] (!%p1121_p9) }
 0x160   : > { %v535_v17 = vmul.f32 %v481_v18, %v481_v18  ;;  %v765_v47 = vadd.f32 (!%p1121_p9), %v738_v52, %v2044_v13  ;;  %v766_v14 = vadd.f32 (!%p1121_p9), %v739_v8, %v2046_v56  ;;  %v767_v30 = vadd.f32 (!%p1121_p9), %v740_v58, %v2071_v37  ;;  %v750_v20 = vld [vmem:[#allocation2 + $0x60] sm:$0xff] (!%p1121_p9)  ;;  %v751_v53 = vld [vmem:[#allocation2 + $0x68] sm:$0xff] (!%p1121_p9)  ;;  %v757_v52 = vld [vmem:[#allocation2 + $0x98] sm:$0xff] (!%p1121_p9) }
 0x161   : > { %v702_v51 = vmul.f32 %v648_v21, %v536_v29  ;;  %v700_v2 = vmul.f32 %v640_v46, %v534_v4  ;;  %v768_v6 = vadd.f32 (!%p1121_p9), %v741_v34, %v2074_v23  ;;  %v769_v12 = vadd.f32 (!%p1121_p9), %v742_v24, %v2099_v55  ;;  %v744_v46 = vld [vmem:[#allocation2 + $0x30] sm:$0xff] (!%p1121_p9)  ;;  %v753_v29 = vld [vmem:[#allocation2 + $0x78] sm:$0xff] (!%p1121_p9)  ;;  %v754_v4 = vld [vmem:[#allocation2 + $0x80] sm:$0xff] (!%p1121_p9) }
 0x162   : > { %v701_v15 = vmul.f32 %v644_v31, %v535_v17  ;;  %v770_v21 = vadd.f32 (!%p1121_p9), %v743_v57, %v2102_v28  ;;  %792 = vst [vmem:[#allocation2] sm:$0xff] (!%p1121_p9), %v765_v47  ;;  %793 = vst [vmem:[#allocation2 + $0x8] sm:$0xff] (!%p1121_p9), %v766_v14  ;;  %v771_v38 = vadd.f32 (!%p1121_p9), %v744_v46, %v2125_v41  ;;  %v758_v8 = vld [vmem:[#allocation2 + $0xa0] sm:$0xff] (!%p1121_p9)  ;;  %v760_v34 = vld [vmem:[#allocation2 + $0xb0] sm:$0xff] (!%p1121_p9) }
 0x163   : > { %v2323_v44 = vsub.f32 %v509_v59, %v702_v51  ;;  %v2325_v63 = vsub.f32 %v507_v19, %v700_v2  ;;  %794 = vst [vmem:[#allocation2 + $0x10] sm:$0xff] (!%p1121_p9), %v767_v30  ;;  %v772_v48 = vadd.f32 (!%p1121_p9), %v745_v26, %v2128_v3  ;;  %v773_v22 = vadd.f32 (!%p1121_p9), %v746_v33, %v2151_v5  ;;  %v2624_v59 = vld [vmem:[#allocation25_spill] sm:$0xff] (!%p1121_p9)  ;;  %v759_v30 = vld [vmem:[#allocation2 + $0xa8] sm:$0xff] (!%p1121_p9) }
 0x164   : > { %v2327_v27 = vsub.f32 %v508_v1, %v701_v15  ;;  %795 = vst [vmem:[#allocation2 + $0x18] sm:$0xff] (!%p1121_p9), %v768_v6  ;;  %796 = vst [vmem:[#allocation2 + $0x20] sm:$0xff] (!%p1121_p9), %v769_v12  ;;  %v774_v0 = vadd.f32 (!%p1121_p9), %v747_v60, %v2154_v62  ;;  %v775_v25 = vadd.f32 (!%p1121_p9), %v748_v42, %v2177_v35  ;;  %v755_v1 = vld [vmem:[#allocation2 + $0x88] sm:$0xff] (!%p1121_p9)  ;;  %v756_v15 = vld [vmem:[#allocation2 + $0x90] sm:$0xff] (!%p1121_p9) }
 0x165   : > { %797 = vst [vmem:[#allocation2 + $0x28] sm:$0xff] %v770_v21  ;;  %v776_v11 = vadd.f32 %v749_v49, %v2180_v43  ;;  %798 = vst [vmem:[#allocation2 + $0x30] sm:$0xff] %v771_v38  ;;  %v777_v19 = vadd.f32 %v750_v20, %v2203_v50  ;;  %v778_v31 = vadd.f32 %v751_v53, %v2624_v59  ;;  %v761_v24 = vld [vmem:[#allocation2 + $0xb8] sm:$0xff]  ;;  %v762_v21 = vld [vmem:[#allocation2 + $0xc0] sm:$0xff] }
 0x166   : > { %799 = vst [vmem:[#allocation2 + $0x38] sm:$0xff] %v772_v48  ;;  %800 = vst [vmem:[#allocation2 + $0x40] sm:$0xff] %v773_v22  ;;  %v779_v18 = vadd.f32 %v752_v61, %v2229_v9  ;;  %v780_v17 = vadd.f32 %v753_v29, %v2232_v16  ;;  %v781_v51 = vadd.f32 %v754_v4, %v2253_v54  ;;  %v763_v46 = vld [vmem:[#allocation2 + $0xc8] sm:$0xff]  ;;  %v764_v26 = vld [vmem:[#allocation2 + $0xd0] sm:$0xff] }
 0x167   : > { %801 = vst [vmem:[#allocation2 + $0x48] sm:$0xff] %v774_v0  ;;  %802 = vst [vmem:[#allocation2 + $0x50] sm:$0xff] %v775_v25  ;;  %v782_v2 = vadd.f32 %v755_v1, %v2256_v7  ;;  %v783_v58 = vadd.f32 %v756_v15, %v2277_v39  ;;  %v784_v47 = vadd.f32 %v757_v52, %v2280_v45 }
 0x168   : > { %803 = vst [vmem:[#allocation2 + $0x58] sm:$0xff] %v776_v11  ;;  %804 = vst [vmem:[#allocation2 + $0x60] sm:$0xff] %v777_v19  ;;  %v785_v14 = vadd.f32 %v758_v8, %v2297_v40  ;;  %v786_v57 = vadd.f32 %v759_v30, %v2300_v10  ;;  %v787_v6 = vadd.f32 %v760_v34, %v2316_v36 }
 0x169   : > { %805 = vst [vmem:[#allocation2 + $0x68] sm:$0xff] %v778_v31  ;;  %806 = vst [vmem:[#allocation2 + $0x70] sm:$0xff] %v779_v18  ;;  %v788_v12 = vadd.f32 %v761_v24, %v2319_v32  ;;  %v789_v33 = vadd.f32 %v762_v21, %v2325_v63  ;;  %v790_v38 = vadd.f32 %v763_v46, %v2327_v27 }
 0x16a   : > { %807 = vst [vmem:[#allocation2 + $0x78] sm:$0xff] %v780_v17  ;;  %808 = vst [vmem:[#allocation2 + $0x80] sm:$0xff] %v781_v51  ;;  %v791_v48 = vadd.f32 %v764_v26, %v2323_v44 }
 0x16b   : > { %809 = vst [vmem:[#allocation2 + $0x88] sm:$0xff] %v782_v2  ;;  %810 = vst [vmem:[#allocation2 + $0x90] sm:$0xff] %v783_v58 }
 0x16c   : > { %811 = vst [vmem:[#allocation2 + $0x98] sm:$0xff] %v784_v47  ;;  %812 = vst [vmem:[#allocation2 + $0xa0] sm:$0xff] %v785_v14 }
 0x16d   : > { %813 = vst [vmem:[#allocation2 + $0xa8] sm:$0xff] %v786_v57  ;;  %814 = vst [vmem:[#allocation2 + $0xb0] sm:$0xff] %v787_v6 }
 0x16e   : > { %815 = vst [vmem:[#allocation2 + $0xb8] sm:$0xff] %v788_v12  ;;  %816 = vst [vmem:[#allocation2 + $0xc0] sm:$0xff] %v789_v33 }
 0x16f   : > { %817 = vst [vmem:[#allocation2 + $0xc8] sm:$0xff] %v790_v38  ;;  %818 = vst [vmem:[#allocation2 + $0xd0] sm:$0xff] %v791_v48 }
 0x170 PF: > { %p1122_p11 = scmp.ge.s32.totalorder %s1833_s30, 8 }
 0x171   : > { %v825_v22 = vstv (!%p1122_p11), %s1833_s30  ;;  %v2625_v0 = vld [vmem:[#allocation39_spill] sm:$0xff] (!%p1122_p11)  ;;  %v863_v29 = vld [vmem:[#allocation2 + $0x38] sm:$0xff] (!%p1122_p11)  ;;  %v866_v52 = vld [vmem:[#allocation2 + $0x50] sm:$0xff] (!%p1122_p11) }
 0x172   : > { %822 = sbr.rel (%p1122_p11) target bundleno = 389 (0x185), region = 48  ;;  %vm2360_vm2 = vcmp.lt.s32.totalorder (!%p1122_p11), %v2625_v0, %v825_v22  ;;  %v864_v2 = vld [vmem:[#allocation2 + $0x40] sm:$0xff] (!%p1122_p11)  ;;  %v867_v8 = vld [vmem:[#allocation2 + $0x58] sm:$0xff] (!%p1122_p11)  ;;  %v870_v57 = vld [vmem:[#allocation2 + $0x70] sm:$0xff] (!%p1122_p11) }
 0x173   : > { %v829_v61 = vsel (!%p1122_p11), %vm2360_vm2, %v2044_v13, 0.0  ;;  %v830_v19 = vsel (!%p1122_p11), %vm2360_vm2, %v2046_v56, 0.0  ;;  %v831_v59 = vsel (!%p1122_p11), %vm2360_vm2, %v2071_v37, 0.0  ;;  %v832_v31 = vsel (!%p1122_p11), %vm2360_vm2, %v2074_v23, 0.0  ;;  %v865_v13 = vld [vmem:[#allocation2 + $0x48] sm:$0xff] (!%p1122_p11)  ;;  %v868_v30 = vld [vmem:[#allocation2 + $0x60] sm:$0xff] (!%p1122_p11) }
 0x174   : > { %v856_v60 = vld [vmem:[#allocation2] sm:$0xff] (!%p1122_p11)  ;;  %v857_v42 = vld [vmem:[#allocation2 + $0x8] sm:$0xff] (!%p1122_p11)  ;;  %v833_v56 = vsel (!%p1122_p11), %vm2360_vm2, %v2099_v55, 0.0  ;;  %v834_v37 = vsel (!%p1122_p11), %vm2360_vm2, %v2102_v28, 0.0  ;;  %v835_v23 = vsel (!%p1122_p11), %vm2360_vm2, %v2125_v41, 0.0  ;;  %v836_v15 = vsel (!%p1122_p11), %vm2360_vm2, %v2128_v3, 0.0 }
 0x175   : > { %v858_v49 = vld [vmem:[#allocation2 + $0x10] sm:$0xff] (!%p1122_p11)  ;;  %v883_v4 = vadd.f32 (!%p1122_p11), %v856_v60, %v829_v61  ;;  %v884_v1 = vadd.f32 (!%p1122_p11), %v857_v42, %v830_v19  ;;  %v890_v14 = vadd.f32 (!%p1122_p11), %v863_v29, %v836_v15  ;;  %v869_v28 = vld [vmem:[#allocation2 + $0x68] sm:$0xff] (!%p1122_p11)  ;;  %v837_v41 = vsel (!%p1122_p11), %vm2360_vm2, %v2151_v5, 0.0  ;;  %v871_v6 = vld [vmem:[#allocation2 + $0x78] sm:$0xff] (!%p1122_p11) }
 0x176   : > { %v859_v11 = vld [vmem:[#allocation2 + $0x18] sm:$0xff] (!%p1122_p11)  ;;  %v860_v20 = vld [vmem:[#allocation2 + $0x20] sm:$0xff] (!%p1122_p11)  ;;  %v885_v17 = vadd.f32 (!%p1122_p11), %v858_v49, %v831_v59  ;;  %v838_v3 = vsel (!%p1122_p11), %vm2360_vm2, %v2154_v62, 0.0  ;;  %v839_v34 = vsel (!%p1122_p11), %vm2360_vm2, %v2177_v35, 0.0  ;;  %v840_v24 = vsel (!%p1122_p11), %vm2360_vm2, %v2180_v43, 0.0  ;;  %v873_v62 = vld [vmem:[#allocation2 + $0x88] sm:$0xff] (!%p1122_p11) }
 0x177   : > { %v861_v53 = vld [vmem:[#allocation2 + $0x28] sm:$0xff] (!%p1122_p11)  ;;  %v862_v18 = vld [vmem:[#allocation2 + $0x30] sm:$0xff] (!%p1122_p11)  ;;  %v886_v51 = vadd.f32 (!%p1122_p11), %v859_v11, %v832_v31  ;;  %910 = vst [vmem:[#allocation2] sm:$0xff] (!%p1122_p11), %v883_v4  ;;  %911 = vst [vmem:[#allocation2 + $0x8] sm:$0xff] (!%p1122_p11), %v884_v1  ;;  %v887_v58 = vadd.f32 (!%p1122_p11), %v860_v20, %v833_v56  ;;  %v891_v12 = vadd.f32 (!%p1122_p11), %v864_v2, %v837_v41  ;;  %v841_v35 = vsel (!%p1122_p11), %vm2360_vm2, %v2203_v50, 0.0 }
 0x178   : > { %912 = vst [vmem:[#allocation2 + $0x10] sm:$0xff] (!%p1122_p11), %v885_v17  ;;  %v888_v55 = vadd.f32 (!%p1122_p11), %v861_v53, %v834_v37  ;;  %v889_v47 = vadd.f32 (!%p1122_p11), %v862_v18, %v835_v23  ;;  %917 = vst [vmem:[#allocation2 + $0x38] sm:$0xff] (!%p1122_p11), %v890_v14  ;;  %v892_v5 = vadd.f32 (!%p1122_p11), %v865_v13, %v838_v3  ;;  %v872_v26 = vld [vmem:[#allocation2 + $0x80] sm:$0xff] (!%p1122_p11)  ;;  %v2628_v33 = vld [vmem:[#allocation25_spill] sm:$0xff] (!%p1122_p11)  ;;  %v843_v38 = vsel (!%p1122_p11), %vm2360_vm2, %v2229_v9, 0.0 }
 0x179   : > { %913 = vst [vmem:[#allocation2 + $0x18] sm:$0xff] %v886_v51  ;;  %914 = vst [vmem:[#allocation2 + $0x20] sm:$0xff] %v887_v58  ;;  %v893_v21 = vadd.f32 %v866_v52, %v839_v34  ;;  %v894_v46 = vadd.f32 %v867_v8, %v840_v24  ;;  %v842_v43 = vsel %vm2360_vm2, %v2628_v33, 0.0  ;;  %v844_v48 = vsel %vm2360_vm2, %v2232_v16, 0.0  ;;  %v874_v22 = vld [vmem:[#allocation2 + $0x90] sm:$0xff]  ;;  %v875_v60 = vld [vmem:[#allocation2 + $0x98] sm:$0xff] }
 0x17a   : > { %915 = vst [vmem:[#allocation2 + $0x28] sm:$0xff] %v888_v55  ;;  %916 = vst [vmem:[#allocation2 + $0x30] sm:$0xff] %v889_v47  ;;  %v895_v42 = vadd.f32 %v868_v30, %v841_v35  ;;  %v896_v50 = vadd.f32 %v869_v28, %v842_v43  ;;  %v897_v49 = vadd.f32 %v870_v57, %v843_v38  ;;  %v876_v11 = vld [vmem:[#allocation2 + $0xa0] sm:$0xff]  ;;  %v877_v20 = vld [vmem:[#allocation2 + $0xa8] sm:$0xff]  ;;  %v845_v9 = vsel %vm2360_vm2, %v2253_v54, 0.0 }
 0x17b   : > { %918 = vst [vmem:[#allocation2 + $0x40] sm:$0xff] %v891_v12  ;;  %919 = vst [vmem:[#allocation2 + $0x48] sm:$0xff] %v892_v5  ;;  %v898_v0 = vadd.f32 %v871_v6, %v844_v48  ;;  %v846_v16 = vsel %vm2360_vm2, %v2256_v7, 0.0  ;;  %v847_v53 = vsel %vm2360_vm2, %v2277_v39, 0.0  ;;  %v848_v61 = vsel %vm2360_vm2, %v2280_v45, 0.0  ;;  %v878_v19 = vld [vmem:[#allocation2 + $0xb0] sm:$0xff] }
 0x17c   : > { %920 = vst [vmem:[#allocation2 + $0x50] sm:$0xff] %v893_v21  ;;  %921 = vst [vmem:[#allocation2 + $0x58] sm:$0xff] %v894_v46  ;;  %v879_v59 = vld [vmem:[#allocation2 + $0xb8] sm:$0xff]  ;;  %v899_v31 = vadd.f32 %v872_v26, %v845_v9  ;;  %v900_v54 = vadd.f32 %v873_v62, %v846_v16  ;;  %v901_v18 = vadd.f32 %v874_v22, %v847_v53  ;;  %v880_v4 = vld [vmem:[#allocation2 + $0xc0] sm:$0xff]  ;;  %v849_v7 = vsel %vm2360_vm2, %v2297_v40, 0.0 }
 0x17d   : > { %922 = vst [vmem:[#allocation2 + $0x60] sm:$0xff] %v895_v42  ;;  %923 = vst [vmem:[#allocation2 + $0x68] sm:$0xff] %v896_v50  ;;  %v902_v29 = vadd.f32 %v875_v60, %v848_v61  ;;  %v850_v39 = vsel %vm2360_vm2, %v2300_v10, 0.0  ;;  %v851_v45 = vsel %vm2360_vm2, %v2316_v36, 0.0  ;;  %v852_v1 = vsel %vm2360_vm2, %v2319_v32, 0.0  ;;  %v881_v17 = vld [vmem:[#allocation2 + $0xc8] sm:$0xff] }
 0x17e   : > { %924 = vst [vmem:[#allocation2 + $0x70] sm:$0xff] %v897_v49  ;;  %925 = vst [vmem:[#allocation2 + $0x78] sm:$0xff] %v898_v0  ;;  %v882_v51 = vld [vmem:[#allocation2 + $0xd0] sm:$0xff]  ;;  %v903_v2 = vadd.f32 %v876_v11, %v849_v7  ;;  %v904_v40 = vadd.f32 %v877_v20, %v850_v39  ;;  %v905_v13 = vadd.f32 %v878_v19, %v851_v45  ;;  %v853_v10 = vsel %vm2360_vm2, %v2325_v63, 0.0 }
 0x17f   : > { %926 = vst [vmem:[#allocation2 + $0x80] sm:$0xff] %v899_v31  ;;  %927 = vst [vmem:[#allocation2 + $0x88] sm:$0xff] %v900_v54  ;;  %v906_v56 = vadd.f32 %v879_v59, %v852_v1  ;;  %v854_v36 = vsel %vm2360_vm2, %v2327_v27, 0.0  ;;  %v855_v32 = vsel %vm2360_vm2, %v2323_v44, 0.0  ;;  %v907_v37 = vadd.f32 %v880_v4, %v853_v10 }
 0x180   : > { %928 = vst [vmem:[#allocation2 + $0x90] sm:$0xff] %v901_v18  ;;  %929 = vst [vmem:[#allocation2 + $0x98] sm:$0xff] %v902_v29  ;;  %v908_v23 = vadd.f32 %v881_v17, %v854_v36  ;;  %v909_v15 = vadd.f32 %v882_v51, %v855_v32 }
 0x181   : > { %930 = vst [vmem:[#allocation2 + $0xa0] sm:$0xff] %v903_v2  ;;  %931 = vst [vmem:[#allocation2 + $0xa8] sm:$0xff] %v904_v40 }
 0x182   : > { %932 = vst [vmem:[#allocation2 + $0xb0] sm:$0xff] %v905_v13  ;;  %933 = vst [vmem:[#allocation2 + $0xb8] sm:$0xff] %v906_v56 }
 0x183   : > { %934 = vst [vmem:[#allocation2 + $0xc0] sm:$0xff] %v907_v37  ;;  %935 = vst [vmem:[#allocation2 + $0xc8] sm:$0xff] %v908_v23 }
 0x184   : > { %936 = vst [vmem:[#allocation2 + $0xd0] sm:$0xff] %v909_v15 }
 0x185 PF: > { %p1123_p13 = scmp.ne.s32.totalorder %s1417_s15, 2 }
 0x186   : > { %v946_v47 = vld [vmem:[#allocation2 + $0x28] sm:$0xff] (!%p1123_p13)  ;;  %v947_v30 = vld [vmem:[#allocation2 + $0x30] sm:$0xff] (!%p1123_p13)  ;;  %v949_v34 = vld [vmem:[#allocation2 + $0x40] sm:$0xff] (!%p1123_p13) }
 0x187   : > { %940 = sbr.rel (%p1123_p13) target bundleno = 653 (0x28d), region = 52  ;;  %v950_v57 = vld [vmem:[#allocation2 + $0x48] sm:$0xff] (!%p1123_p13)  ;;  %v951_v12 = vld [vmem:[#allocation2 + $0x50] sm:$0xff] (!%p1123_p13)  ;;  %v952_v21 = vld [vmem:[#allocation2 + $0x58] sm:$0xff] (!%p1123_p13) }
 0x188   : > { %v953_v26 = vld [vmem:[#allocation2 + $0x60] sm:$0xff] (!%p1123_p13)  ;;  %v954_v35 = vld [vmem:[#allocation2 + $0x68] sm:$0xff] (!%p1123_p13)  ;;  %v955_v43 = vld [vmem:[#allocation2 + $0x70] sm:$0xff] (!%p1123_p13) }
 0x189   : > { %v956_v48 = vld [vmem:[#allocation2 + $0x78] sm:$0xff] (!%p1123_p13)  ;;  %v957_v60 = vld [vmem:[#allocation2 + $0x80] sm:$0xff] (!%p1123_p13)  ;;  %v958_v50 = vld [vmem:[#allocation2 + $0x88] sm:$0xff] (!%p1123_p13) }
 0x18a   : > { %v941_v63 = vld [vmem:[#allocation2] sm:$0xff] (!%p1123_p13)  ;;  %v942_v27 = vld [vmem:[#allocation2 + $0x8] sm:$0xff] (!%p1123_p13)  ;;  %v959_v0 = vld [vmem:[#allocation2 + $0x90] sm:$0xff] (!%p1123_p13) }
 0x18b   : > { %v943_v52 = vld [vmem:[#allocation2 + $0x10] sm:$0xff] (!%p1123_p13)  ;;  %v968_v8 = vadd.f32 (!%p1123_p13), %v942_v27, %v941_v63  ;;  %v948_v41 = vld [vmem:[#allocation2 + $0x38] sm:$0xff] (!%p1123_p13)  ;;  %v961_v16 = vld [vmem:[#allocation2 + $0xa0] sm:$0xff] (!%p1123_p13) }
 0x18c   : > { %v944_v25 = vld [vmem:[#allocation2 + $0x18] sm:$0xff] (!%p1123_p13)  ;;  %v945_v58 = vld [vmem:[#allocation2 + $0x20] sm:$0xff] (!%p1123_p13)  ;;  %v962_v61 = vld [vmem:[#allocation2 + $0xa8] sm:$0xff] (!%p1123_p13) }
 0x18d   : > { %v969_v44 = vadd.f32 (!%p1123_p13), %v968_v8, %v943_v52  ;;  %v960_v20 = vld [vmem:[#allocation2 + $0x98] sm:$0xff] (!%p1123_p13)  ;;  %v963_v59 = vld [vmem:[#allocation2 + $0xb0] sm:$0xff] (!%p1123_p13)  ;;  %v965_v29 = vld [vmem:[#allocation2 + $0xc0] sm:$0xff] (!%p1123_p13) }
 0x18e   : > { %v964_v54 = vld [vmem:[#allocation2 + $0xb8] sm:$0xff]  ;;  %v966_v7 = vld [vmem:[#allocation2 + $0xc8] sm:$0xff]  ;;  %v967_v45 = vld [vmem:[#allocation2 + $0xd0] sm:$0xff] }
 0x18f   : > { %v970_v55 = vadd.f32 %v969_v44, %v944_v25 }
 0x191   : > { %v971_v14 = vadd.f32 %v970_v55, %v945_v58 }
 0x193   : > { %v972_v28 = vadd.f32 %v971_v14, %v946_v47 }
 0x195   : > { %v973_v3 = vadd.f32 %v972_v28, %v947_v30 }
 0x197   : > { %v974_v24 = vadd.f32 %v973_v3, %v948_v41 }
 0x199   : > { %v975_v6 = vadd.f32 %v974_v24, %v949_v34 }
 0x19b   : > { %v976_v5 = vadd.f32 %v975_v6, %v950_v57 }
 0x19d   : > { %v977_v46 = vadd.f32 %v976_v5, %v951_v12 }
 0x19f   : > { %v978_v62 = vadd.f32 %v977_v46, %v952_v21 }
 0x1a1   : > { %v979_v33 = vadd.f32 %v978_v62, %v953_v26 }
 0x1a3   : > { %v980_v38 = vadd.f32 %v979_v33, %v954_v35 }
 0x1a5   : > { %v981_v22 = vadd.f32 %v980_v38, %v955_v43 }
 0x1a7   : > { %v982_v42 = vadd.f32 %v981_v22, %v956_v48 }
 0x1a9   : > { %v983_v49 = vadd.f32 %v982_v42, %v957_v60 }
 0x1ab   : > { %v984_v11 = vadd.f32 %v983_v49, %v958_v50 }
 0x1ad   : > { %v985_v9 = vadd.f32 %v984_v11, %v959_v0 }
 0x1af   : > { %v986_v53 = vadd.f32 %v985_v9, %v960_v20 }
 0x1b1   : > { %v987_v19 = vadd.f32 %v986_v53, %v961_v16 }
 0x1b3   : > { %v988_v31 = vadd.f32 %v987_v19, %v962_v61 }
 0x1b5   : > { %v989_v18 = vadd.f32 %v988_v31, %v963_v59 }
 0x1b7   : > { %v990_v4 = vadd.f32 %v989_v18, %v964_v54 }
 0x1b9   : > { %v991_v39 = vadd.f32 %v990_v4, %v965_v29 }
 0x1bb   : > { %v992_v1 = vadd.f32 %v991_v39, %v966_v7 }
 0x1bd   : > { %v993_v17 = vadd.f32 %v992_v1, %v967_v45 }
 0x1bf   : > { %994 = vadd.xlane.f32.xlu0 %v993_v17 }
 0x24c   : > { %v995_v51 = vpop.xlane.xlu0 %994 }
 0x24d   : > { %v996_v2 = vrot.slane %v995_v51, 4 }
 0x24f   : > { %v997_v40 = vadd.f32 %v996_v2, %v995_v51 }
 0x251   : > { %v998_v13 = vrot.slane %v997_v40, 2 }
 0x253   : > { %v999_v56 = vadd.f32 %v998_v13, %v997_v40 }
 0x255   : > { %v1000_v10 = vrot.slane %v999_v56, 1 }
 0x257   : > { %v1001_v36 = vadd.f32 %v1000_v10, %v999_v56 }
 0x259   : > { %1131 = vpush %v1001_v36 }
 0x28a   : > { %s1132_s15 = spop %1131 }
 0x28b   : > { %v1003_v32 = vstv %s1132_s15 }
 0x28c   : > { %1004 = vst [vmem:[%s196_s5] sm:$0xff] %v1003_v32 }
 0x28d PF: > { %s1125_s21 = sshll.u32 %s1421_s16, 7  ;;  %s1019_s7 = sshll.u32 %s196_s5, 4  ;;  %s1020_s7 = int_to_ptr.vmem [resolvable:$true] %s1019_s7 }
 0x28e   : > { %s2452_s4 = scalar_lea.hbm %s2514_s2, %s1125_s21  ;;  %s1006_s28 = scalar_lea.sflag [#allocation5], %s194_s17 }
 0x28f   : > { %s1307_s23 = scalar_lea.vmem %s1020_s7, 128  ;;  %p2629_p4 = scmp.ne.s32.totalorder %s2552_s25, 0 }
 0x290   : > { %p1308_p2 = scmp.ne.s32.totalorder %s1020_s7, %s1307_s23  ;;  %s1440_s1 = smov [#allocation8]  }
 0x291   : > { %s1311_s18 = sshll.u32 %s1440_s1, 4  ;;  %s1312_s18 = int_to_ptr.vmem [resolvable:$false] %s1311_s18 }
 0x292   : > { %p1309_p6 = pnand %p1308_p2, %p2629_p4  ;;  %s1313_s22 = scalar_lea.vmem %s1312_s18, 256 }
 0x293   : > { %p1314_p12 = scmp.lt.s32.totalorder %s1020_s7, %s1312_s18  ;;  %p1315_p1 = scmp.lt.s32.totalorder %s1313_s22, %s1307_s23 }
 0x294   : > { %p1310_p8 = pneg %p1309_p6 }
 0x295   : > { %p1316_p3 = por %p1315_p1, %p1314_p12 }
 0x297   : > { %p1317_p0 = pnand %p1316_p3, %p1310_p8 }
 0x299   : > { %1320 = shalt.err (!%p1317_p0)
}
 0x29a   : > { %s1321_s16 = scalar_lea.hbm %s2452_s4, 128  ;;  %s1325_s5 = scalar_lea.hbm %s2514_s2, 256 }
 0x29b   : > { %p1322_p10 = scmp.ne.s32.totalorder %s2452_s4, %s1321_s16  ;;  %p1326_p9 = scmp.lt.u32.totalorder %s2452_s4, %s2514_s2 }
 0x29c   : > { %p1327_p11 = scmp.lt.u32.totalorder %s1325_s5, %s1321_s16  ;;  %p1329_p2 = scmp.lt.u32.totalorder %s1321_s16, %s2452_s4 }
 0x29d   : > { %p1323_p7 = pnand %p1322_p10, %p2629_p4 }
 0x29e   : > { %p1328_p13 = por %p1327_p11, %p1326_p9 }
 0x29f   : > { %p1324_p5 = pneg %p1323_p7 }
 0x2a0   : > { %p1330_p6 = por %p1329_p2, %p1328_p13 }
 0x2a2   : > { %p1331_p8 = pnand %p1330_p6, %p1324_p5 }
 0x2a4   : > { %1334 = shalt.err (!%p1331_p8)
}
 0x2a5   : > { %1139 = dma.vmem_to_hbm [thread:$0]  (%p2629_p4), %s1020_s7, 128, %s2452_s4, %s1006_s28  }
 0x2a6 PF: > { %p1156_p12 = scmp.ge.s32.totalorder %s1433_s19, 2  ;;  %s1031_s12 = sand.u32 1, %s1393_s9  }
 0x2a7   : > { %p2630_p1 = scmp.ne.s32.totalorder %s2553_s26, 0  ;;  %s1032_s6 = scalar_lea.sflag [#allocation5], %s1031_s12 }
 0x2a9   : > { %p1150_p3 = pnand %p1156_p12, %p2630_p1 }
 0x2ab   : > { %1388 = dma.done.wait (!%p1150_p3), %s1032_s6, 128  }
 0x2ac   : > { %1390 = vsyncadd (!%p1150_p3), %s1032_s6, 4294967168  ;;  %s19_s19 = sadd.s32 1, %s1433_s19   ;;  %s2631_s30 = sld [smem:[#allocation16_spill]] }
 0x2ad   : > { %p16_p0 = scmp.ge.s32.totalorder %s19_s19, 8   ;;  %s2632_s15 = sld [smem:[#allocation12_spill]] }
 0x2ae   : > { %s2633_s16 = sld [smem:[#allocation13_spill]]  ;;  %s2634_s17 = sld [smem:[#allocation14_spill]] }
 0x2af   : > { %s2635_s18 = sld [smem:[#allocation15_spill]]  ;;  %s2636_s9 = smov %s1397_s10 }
 0x2b0   : > { %s2637_s10 = smov %s1401_s11  ;;  %s2639_s12 = smov %s1409_s13 }
 0x2b1   : > { %s2640_s13 = smov %s1413_s14  ;;  %s2641_s14 = smov %s1601_s3 }
 0x2b2   : > { %s2638_s11 = smov %s2631_s30  ;;  %18 = sbr.rel (!%p16_p0) target bundleno = 12 (0xc), region = 93 }
 0x2b9   :  { %1037 = vsyncpa [#allocation4], 1 }
 0x2ba   :  { %1039 = vsyncpa [#allocation4 + $0x1], 1 }
 0x2bb   :  { %1040 = vsyncpa [#allocation7], 1 }
 0x2bc   :  { %1041 = vsyncpa [#allocation5], 1 }
 0x2bd   :  { %1043 = vsyncpa [#allocation5 + $0x1], 1 }

</bundles_post_ra>
